<compile_context>
chip_gen: v7x
topology: tpu7x:2x2x1
jax: 0.10.0
libtpu: 0.0.40
codegen_flags: <defaults>
</compile_context>

<pallas_src>
import math
import numpy as np
import jax
import jax.numpy as jnp
from jax.experimental import pallas as pl
from jax.experimental.pallas import tpu as pltpu

# ----- configuration: DecoderBlock(input_dim=16, output_dim=8, stride=2) -----
CIN = 16
COUT = 8
STRIDE = 2
KT = 2 * STRIDE                         # ConvTranspose1d kernel size = 4
PT = math.ceil(STRIDE / 2)              # ConvTranspose1d padding = 1
B = 2
L = 16                                  # input sequence length
LOUT = (L - 1) * STRIDE - 2 * PT + KT   # = 32, length after ConvTranspose1d / each ResidualUnit
DILATIONS = (1, 3, 9)

LIN = B * L                             # 32: input lanes  (batch fused onto lane axis)
LANES = B * LOUT                        # 64: output lanes (batch fused onto lane axis)

# ---- weight slab layout: stacked per-tap weight matrices, shape (W_ROWS, CIN) ----
W_COLS = CIN                                         # 16 (8-wide items zero-padded)
WT_ROW = 0                                           # KT taps of (COUT, CIN)
W7_ROW = KT * COUT                                   # 32: per-unit 7-tap stacks (7*COUT, COUT)
W1_ROW = W7_ROW + len(DILATIONS) * 7 * COUT          # 200: per-unit k=1 weights (COUT, COUT)
W_ROWS = W1_ROW + len(DILATIONS) * COUT              # 224

# ---- vector slab layout (per-channel constants, pre-broadcast along LANES) ----
V_A0, V_IA0, V_BT = 0, CIN, 2 * CIN
V_BASE = 2 * CIN + COUT                              # 40
V_STEP = 6 * COUT                                    # 48 rows per residual unit
V_ROWS = V_BASE + len(DILATIONS) * V_STEP            # 184

# ---- constant 0/1 matrix slab: KT scatter matrices + 14 unique shift matrices ----
SHIFT_OFFSETS = tuple(sorted({(k - 3) * d for d in DILATIONS for k in range(7) if k != 3}))
OFF_IDX = {off: KT + i for i, off in enumerate(SHIFT_OFFSETS)}
N_MAT = KT + len(SHIFT_OFFSETS)                      # 18


def _snake(x, alpha, inv_alpha):
    # snake(x) = x + 1/(alpha + 1e-9) * sin(alpha * x)^2 ; reciprocal precomputed on host
    s = jnp.sin(alpha * x)
    return x + inv_alpha * (s * s)


def decoder_block_kernel(x_ref, w_ref, v_ref, m_ref, o_ref):
    f32 = jnp.float32
    x = x_ref[...]                                            # (CIN, LIN), batch on lanes

    # Snake1d(input_dim) on the raw input
    xs = _snake(x, v_ref[V_A0:V_A0 + CIN, :LIN], v_ref[V_IA0:V_IA0 + CIN, :LIN])

    # --- WNConvTranspose1d: one stacked weight matmul, then per-tap constant scatter ---
    # out[:, n] += Wt_k^T @ xs[:, l] for n = 2l + k - 1; scatter matrices are host-built,
    # block-diagonal per batch segment.
    yt = jnp.dot(w_ref[WT_ROW:WT_ROW + KT * COUT, :], xs,
                 preferred_element_type=f32)                  # (KT*COUT, LIN)
    h = v_ref[V_BT:V_BT + COUT]                               # bias, (COUT, LANES)
    for k in range(KT):
        h = h + jnp.dot(yt[k * COUT:(k + 1) * COUT, :], m_ref[k][:LIN, :],
                        preferred_element_type=f32)           # (8,32)@(32,64)

    # --- 3 ResidualUnits (dilation 1, 3, 9; same-length convs -> no residual crop) ---
    for u, d in enumerate(DILATIONS):
        vb = V_BASE + u * V_STEP
        z = _snake(h, v_ref[vb:vb + COUT], v_ref[vb + COUT:vb + 2 * COUT])

        # dilated k=7 "same" conv: one stacked (56,8)@(8,64) weight matmul, then per-tap
        # accumulate matmuls with host-built block-diagonal shift matrices (boundary zeros
        # match the reference's zero padding; snake(0)=0 makes this exact).
        y7 = jnp.dot(w_ref[W7_ROW + u * 7 * COUT:W7_ROW + (u + 1) * 7 * COUT, :COUT], z,
                     preferred_element_type=f32)              # (7*COUT, LANES)
        c = v_ref[vb + 2 * COUT:vb + 3 * COUT] + y7[3 * COUT:4 * COUT, :]  # bias + center tap
        for k in range(7):
            if k == 3:
                continue
            c = c + jnp.dot(y7[k * COUT:(k + 1) * COUT, :],
                            m_ref[OFF_IDX[(k - 3) * d]],
                            preferred_element_type=f32)       # (8,64)@(64,64)

        c = _snake(c, v_ref[vb + 3 * COUT:vb + 4 * COUT],
                   v_ref[vb + 4 * COUT:vb + 5 * COUT])
        c = jnp.dot(w_ref[W1_ROW + u * COUT:W1_ROW + (u + 1) * COUT, :COUT], c,
                    preferred_element_type=f32)               # WNConv1d(k=1)
        h = h + c + v_ref[vb + 5 * COUT:vb + 6 * COUT]

    # TODO(synk): with B=2, L=16 the output is only 64 lanes wide; only a larger batch or a
    # >=128-sample length chunk per step would make this store an unmasked full-width vst.
    o_ref[...] = h


@jax.jit
def decoder_block_forward(x, wslab, vslab, mslab):
    # Lay batch along the lane axis: (B, CIN, L) -> (CIN, B*L).
    x2 = jnp.transpose(x, (1, 0, 2)).reshape(CIN, LIN)
    out2 = pl.pallas_call(
        decoder_block_kernel,
        out_shape=jax.ShapeDtypeStruct((COUT, LANES), jnp.float32),
        grid=(1,),   # single step for the whole fused-batch problem
        in_specs=[
            pl.BlockSpec((CIN, LIN), lambda i: (0, 0)),
            pl.BlockSpec((W_ROWS, W_COLS), lambda i: (0, 0)),
            pl.BlockSpec((V_ROWS, LANES), lambda i: (0, 0)),
            pl.BlockSpec((N_MAT, LANES, LANES), lambda i: (0, 0, 0)),
        ],
        out_specs=pl.BlockSpec((COUT, LANES), lambda i: (0, 0)),
        compiler_params=pltpu.CompilerParams(dimension_semantics=("arbitrary",)),
    )(x2, wslab, vslab, mslab)
    # (COUT, B*LOUT) -> (B, COUT, LOUT)
    return jnp.transpose(out2.reshape(COUT, B, LOUT), (1, 0, 2))


# ------------------------- one-time parameter packing -------------------------
def pack_params(p):
    pn = {k: np.asarray(v, np.float32) for k, v in p.items()}

    # weight slab: stacked per-tap weight matrices, (W_ROWS, CIN)
    rows = [pn["wt"][:, :, k].T for k in range(KT)]                       # (COUT, CIN) each
    for u in range(len(DILATIONS)):
        for k in range(7):
            rows.append(np.pad(pn["rw7"][u][:, :, k], ((0, 0), (0, W_COLS - COUT))))
    for u in range(len(DILATIONS)):
        rows.append(np.pad(pn["rw1"][u][:, :, 0], ((0, 0), (0, W_COLS - COUT))))
    wslab = np.concatenate(rows, axis=0)
    assert wslab.shape == (W_ROWS, W_COLS)

    # vector slab: alphas, precomputed 1/(alpha+1e-9), biases; pre-broadcast along lanes
    inv = lambda a: 1.0 / (a + np.float32(1e-9))
    vrows = [pn["a0"], inv(pn["a0"]), pn["bt"]]
    for u in range(len(DILATIONS)):
        vrows += [pn["rua"][u], inv(pn["rua"][u]), pn["rb7"][u],
                  pn["rub"][u], inv(pn["rub"][u]), pn["rb1"][u]]
    vslab = np.concatenate(
        [np.broadcast_to(np.reshape(r, (-1, 1)), (r.size, LANES)) for r in vrows], axis=0)
    assert vslab.shape == (V_ROWS, LANES)

    # constant 0/1 matrix slab (block-diagonal per batch segment)
    mats = np.zeros((N_MAT, LANES, LANES), np.float32)
    for k in range(KT):                       # transposed-conv scatter: n = STRIDE*l + k - PT
        for b in range(B):
            for l in range(L):
                n = STRIDE * l + k - PT
                if 0 <= n < LOUT:
                    mats[k, b * L + l, b * LOUT + n] = 1.0
    for off, idx in OFF_IDX.items():          # dilated-conv shift: src n = m + off (valid only)
        for b in range(B):
            for m in range(LOUT):
                n = m + off
                if 0 <= n < LOUT:
                    mats[idx, b * LOUT + n, b * LOUT + m] = 1.0

    return jnp.asarray(wslab), jnp.asarray(vslab), jnp.asarray(mats)


# ------------------------------ parameter init ------------------------------
def init_params(key):
    ks = iter(jax.random.split(key, 32))   # 28 keys needed; extra headroom

    def wn(v, g):
        # PyTorch weight_norm (dim=0): w = g * v / ||v|| over all dims except 0
        norm = jnp.sqrt(jnp.sum(v * v, axis=tuple(range(1, v.ndim)), keepdims=True))
        return g.reshape((-1,) + (1,) * (v.ndim - 1)) * v / norm

    a0 = jax.random.uniform(next(ks), (CIN, 1), jnp.float32, 0.5, 1.5)

    wt_v = 0.3 * jax.random.normal(next(ks), (CIN, COUT, KT), jnp.float32)
    wt_g = jax.random.uniform(next(ks), (CIN,), jnp.float32, 0.5, 1.5)
    wt = wn(wt_v, wt_g)
    bt = 0.1 * jax.random.normal(next(ks), (COUT,), jnp.float32)

    rua, rw7, rb7, rub, rw1, rb1 = [], [], [], [], [], []
    for _ in DILATIONS:
        rua.append(jax.random.uniform(next(ks), (COUT, 1), jnp.float32, 0.5, 1.5))
        v7 = 0.2 * jax.random.normal(next(ks), (COUT, COUT, 7), jnp.float32)
        g7 = jax.random.uniform(next(ks), (COUT,), jnp.float32, 0.5, 1.5)
        rw7.append(wn(v7, g7))
        rb7.append(0.1 * jax.random.normal(next(ks), (COUT,), jnp.float32))
        rub.append(jax.random.uniform(next(ks), (COUT, 1), jnp.float32, 0.5, 1.5))
        v1 = 0.3 * jax.random.normal(next(ks), (COUT, COUT, 1), jnp.float32)
        g1 = jax.random.uniform(next(ks), (COUT,), jnp.float32, 0.5, 1.5)
        rw1.append(wn(v1, g1))
        rb1.append(0.1 * jax.random.normal(next(ks), (COUT,), jnp.float32))

    return {
        "a0": a0, "wt": wt, "bt": bt,
        "rua": jnp.stack(rua), "rw7": jnp.stack(rw7), "rb7": jnp.stack(rb7),
        "rub": jnp.stack(rub), "rw1": jnp.stack(rw1), "rb1": jnp.stack(rb1),
    }


# ------------------- numpy reference (PyTorch semantics) -------------------
def ref_snake(x, alpha):
    a = alpha.reshape(1, -1, 1)
    return x + (1.0 / (a + 1e-9)) * np.sin(a * x) ** 2


def ref_conv_transpose1d(x, w, b, stride, padding):
    Bn, _, Lx = x.shape
    _, Cout, K = w.shape
    Lfull = (Lx - 1) * stride + K
    out = np.zeros((Bn, Cout, Lfull), np.float64)
    for k in range(K):
        contrib = np.einsum("bil,io->bol", x, w[:, :, k])
        out[:, :, k:k + (Lx - 1) * stride + 1:stride] += contrib
    return out[:, :, padding:Lfull - padding] + b.reshape(1, -1, 1)


def ref_conv1d(x, w, b, dilation, padding):
    Bn, _, Lx = x.shape
    Cout, _, K = w.shape
    xp = np.pad(x, ((0, 0), (0, 0), (padding, padding)))
    Lo = Lx + 2 * padding - dilation * (K - 1)
    out = np.zeros((Bn, Cout, Lo), np.float64)
    for k in range(K):
        out += np.einsum("bil,oi->bol", xp[:, :, k * dilation:k * dilation + Lo], w[:, :, k])
    return out + b.reshape(1, -1, 1)


def ref_decoder_block(x, p):
    h = ref_snake(x, p["a0"])
    h = ref_conv_transpose1d(h, p["wt"], p["bt"], STRIDE, PT)
    for u, d in enumerate(DILATIONS):
        y = ref_snake(h, p["rua"][u])
        y = ref_conv1d(y, p["rw7"][u], p["rb7"][u], d, 3 * d)
        y = ref_snake(y, p["rub"][u])
        y = ref_conv1d(y, p["rw1"][u], p["rb1"][u], 1, 0)
        h = h + y   # same-length convs -> no crop
    return h


if __name__ == "__main__":
    key = jax.random.PRNGKey(0)
    kx, kp = jax.random.split(key)
    x = jax.random.normal(kx, (B, CIN, L), jnp.float32)
    params = init_params(kp)
    wslab, vslab, mslab = pack_params(params)     # packed once, reused every call

    out = decoder_block_forward(x, wslab, vslab, mslab)
    out = jax.block_until_ready(out)

    params_np = {k: np.asarray(v, np.float64) for k, v in params.items()}
    ref = ref_decoder_block(np.asarray(x, np.float64), params_np)
    np.testing.assert_allclose(np.asarray(out), ref, rtol=2e-3, atol=2e-3)

    print("KERNEL_OK")
</pallas_src>

<mosaic_0001>
module attributes {stable_mosaic.version = 11 : i64} {
  func.func @decoder_block_kernel(%arg0: i32, %arg1: memref<16x32xf32, #tpu.memory_space<vmem>>, %arg2: memref<224x16xf32, #tpu.memory_space<vmem>>, %arg3: memref<184x64xf32, #tpu.memory_space<vmem>>, %arg4: memref<18x64x64xf32, #tpu.memory_space<vmem>>, %arg5: memref<8x64xf32, #tpu.memory_space<vmem>>) attributes {dimension_semantics = [#tpu.dimension_semantics<arbitrary>], iteration_bounds = array<i64: 1>, scalar_prefetch = 0 : i64, scratch_operands = 0 : i64, tpu.core_type = #tpu.core_type<tc>, window_params = [{pipeline_mode = #tpu.pipeline_mode<synchronous>, transform_indices = @transform_0, window_bounds = array<i64: 16, 32>}, {pipeline_mode = #tpu.pipeline_mode<synchronous>, transform_indices = @transform_1, window_bounds = array<i64: 224, 16>}, {pipeline_mode = #tpu.pipeline_mode<synchronous>, transform_indices = @transform_2, window_bounds = array<i64: 184, 64>}, {pipeline_mode = #tpu.pipeline_mode<synchronous>, transform_indices = @transform_3, window_bounds = array<i64: 18, 64, 64>}, {pipeline_mode = #tpu.pipeline_mode<synchronous>, transform_indices = @transform_4, window_bounds = array<i64: 8, 64>}]} {
    %c0 = arith.constant 0 : index
    %c0_0 = arith.constant 0 : index
    %0 = vector.load %arg1[%c0, %c0_0] : memref<16x32xf32, #tpu.memory_space<vmem>>, vector<16x32xf32>
    %c0_1 = arith.constant 0 : index
    %c0_2 = arith.constant 0 : index
    %1 = vector.load %arg3[%c0_1, %c0_2] : memref<184x64xf32, #tpu.memory_space<vmem>>, vector<16x32xf32>
    %c16 = arith.constant 16 : index
    %c0_3 = arith.constant 0 : index
    %2 = vector.load %arg3[%c16, %c0_3] : memref<184x64xf32, #tpu.memory_space<vmem>>, vector<16x32xf32>
    %3 = arith.mulf %1, %0 : vector<16x32xf32>
    %4 = math.sin %3 : vector<16x32xf32>
    %5 = arith.mulf %4, %4 : vector<16x32xf32>
    %6 = arith.mulf %2, %5 : vector<16x32xf32>
    %7 = arith.addf %0, %6 : vector<16x32xf32>
    %c0_4 = arith.constant 0 : index
    %c0_5 = arith.constant 0 : index
    %8 = vector.load %arg2[%c0_4, %c0_5] : memref<224x16xf32, #tpu.memory_space<vmem>>, vector<32x16xf32>
    %cst = arith.constant dense<0.000000e+00> : vector<32x32xf32>
    %9 = tpu.matmul %8, %7, %cst {dimension_numbers = #tpu.dot_dimension_numbers<[1], [0], [0], [1], [0, 0, 1, 1], [], []>} : vector<32x16xf32>, vector<16x32xf32>, vector<32x32xf32> -> vector<32x32xf32>
    %c32 = arith.constant 32 : index
    %c0_6 = arith.constant 0 : index
    %10 = vector.load %arg3[%c32, %c0_6] : memref<184x64xf32, #tpu.memory_space<vmem>>, vector<8x64xf32>
    %11 = vector.extract_strided_slice %9 {offsets = [0, 0], sizes = [8, 32], strides = [1, 1]} : vector<32x32xf32> to vector<8x32xf32>
    %c0_7 = arith.constant 0 : index
    %c0_8 = arith.constant 0 : index
    %c0_9 = arith.constant 0 : index
    %12 = vector.load %arg4[%c0_7, %c0_8, %c0_9] : memref<18x64x64xf32, #tpu.memory_space<vmem>>, vector<1x64x64xf32>
    %13 = vector.shape_cast %12 : vector<1x64x64xf32> to vector<64x64xf32>
    %14 = vector.extract_strided_slice %13 {offsets = [0, 0], sizes = [32, 64], strides = [1, 1]} : vector<64x64xf32> to vector<32x64xf32>
    %cst_10 = arith.constant dense<0.000000e+00> : vector<8x64xf32>
    %15 = tpu.matmul %11, %14, %cst_10 {dimension_numbers = #tpu.dot_dimension_numbers<[1], [0], [0], [1], [0, 0, 1, 1], [], []>} : vector<8x32xf32>, vector<32x64xf32>, vector<8x64xf32> -> vector<8x64xf32>
    %16 = arith.addf %10, %15 : vector<8x64xf32>
    %17 = vector.extract_strided_slice %9 {offsets = [8, 0], sizes = [8, 32], strides = [1, 1]} : vector<32x32xf32> to vector<8x32xf32>
    %c1 = arith.constant 1 : index
    %c0_11 = arith.constant 0 : index
    %c0_12 = arith.constant 0 : index
    %18 = vector.load %arg4[%c1, %c0_11, %c0_12] : memref<18x64x64xf32, #tpu.memory_space<vmem>>, vector<1x64x64xf32>
    %19 = vector.shape_cast %18 : vector<1x64x64xf32> to vector<64x64xf32>
    %20 = vector.extract_strided_slice %19 {offsets = [0, 0], sizes = [32, 64], strides = [1, 1]} : vector<64x64xf32> to vector<32x64xf32>
    %cst_13 = arith.constant dense<0.000000e+00> : vector<8x64xf32>
    %21 = tpu.matmul %17, %20, %cst_13 {dimension_numbers = #tpu.dot_dimension_numbers<[1], [0], [0], [1], [0, 0, 1, 1], [], []>} : vector<8x32xf32>, vector<32x64xf32>, vector<8x64xf32> -> vector<8x64xf32>
    %22 = arith.addf %16, %21 : vector<8x64xf32>
    %23 = vector.extract_strided_slice %9 {offsets = [16, 0], sizes = [8, 32], strides = [1, 1]} : vector<32x32xf32> to vector<8x32xf32>
    %c2 = arith.constant 2 : index
    %c0_14 = arith.constant 0 : index
    %c0_15 = arith.constant 0 : index
    %24 = vector.load %arg4[%c2, %c0_14, %c0_15] : memref<18x64x64xf32, #tpu.memory_space<vmem>>, vector<1x64x64xf32>
    %25 = vector.shape_cast %24 : vector<1x64x64xf32> to vector<64x64xf32>
    %26 = vector.extract_strided_slice %25 {offsets = [0, 0], sizes = [32, 64], strides = [1, 1]} : vector<64x64xf32> to vector<32x64xf32>
    %cst_16 = arith.constant dense<0.000000e+00> : vector<8x64xf32>
    %27 = tpu.matmul %23, %26, %cst_16 {dimension_numbers = #tpu.dot_dimension_numbers<[1], [0], [0], [1], [0, 0, 1, 1], [], []>} : vector<8x32xf32>, vector<32x64xf32>, vector<8x64xf32> -> vector<8x64xf32>
    %28 = arith.addf %22, %27 : vector<8x64xf32>
    %29 = vector.extract_strided_slice %9 {offsets = [24, 0], sizes = [8, 32], strides = [1, 1]} : vector<32x32xf32> to vector<8x32xf32>
    %c3 = arith.constant 3 : index
    %c0_17 = arith.constant 0 : index
    %c0_18 = arith.constant 0 : index
    %30 = vector.load %arg4[%c3, %c0_17, %c0_18] : memref<18x64x64xf32, #tpu.memory_space<vmem>>, vector<1x64x64xf32>
    %31 = vector.shape_cast %30 : vector<1x64x64xf32> to vector<64x64xf32>
    %32 = vector.extract_strided_slice %31 {offsets = [0, 0], sizes = [32, 64], strides = [1, 1]} : vector<64x64xf32> to vector<32x64xf32>
    %cst_19 = arith.constant dense<0.000000e+00> : vector<8x64xf32>
    %33 = tpu.matmul %29, %32, %cst_19 {dimension_numbers = #tpu.dot_dimension_numbers<[1], [0], [0], [1], [0, 0, 1, 1], [], []>} : vector<8x32xf32>, vector<32x64xf32>, vector<8x64xf32> -> vector<8x64xf32>
    %34 = arith.addf %28, %33 : vector<8x64xf32>
    %c40 = arith.constant 40 : index
    %c0_20 = arith.constant 0 : index
    %35 = vector.load %arg3[%c40, %c0_20] : memref<184x64xf32, #tpu.memory_space<vmem>>, vector<8x64xf32>
    %c48 = arith.constant 48 : index
    %c0_21 = arith.constant 0 : index
    %36 = vector.load %arg3[%c48, %c0_21] : memref<184x64xf32, #tpu.memory_space<vmem>>, vector<8x64xf32>
    %37 = arith.mulf %35, %34 : vector<8x64xf32>
    %38 = math.sin %37 : vector<8x64xf32>
    %39 = arith.mulf %38, %38 : vector<8x64xf32>
    %40 = arith.mulf %36, %39 : vector<8x64xf32>
    %41 = arith.addf %34, %40 : vector<8x64xf32>
    %c32_22 = arith.constant 32 : index
    %c0_23 = arith.constant 0 : index
    %42 = vector.load %arg2[%c32_22, %c0_23] : memref<224x16xf32, #tpu.memory_space<vmem>>, vector<56x8xf32>
    %cst_24 = arith.constant dense<0.000000e+00> : vector<56x64xf32>
    %43 = tpu.matmul %42, %41, %cst_24 {dimension_numbers = #tpu.dot_dimension_numbers<[1], [0], [0], [1], [0, 0, 1, 1], [], []>} : vector<56x8xf32>, vector<8x64xf32>, vector<56x64xf32> -> vector<56x64xf32>
    %c56 = arith.constant 56 : index
    %c0_25 = arith.constant 0 : index
    %44 = vector.load %arg3[%c56, %c0_25] : memref<184x64xf32, #tpu.memory_space<vmem>>, vector<8x64xf32>
    %45 = vector.extract_strided_slice %43 {offsets = [24, 0], sizes = [8, 64], strides = [1, 1]} : vector<56x64xf32> to vector<8x64xf32>
    %46 = arith.addf %44, %45 : vector<8x64xf32>
    %47 = vector.extract_strided_slice %43 {offsets = [0, 0], sizes = [8, 64], strides = [1, 1]} : vector<56x64xf32> to vector<8x64xf32>
    %c8 = arith.constant 8 : index
    %c0_26 = arith.constant 0 : index
    %c0_27 = arith.constant 0 : index
    %48 = vector.load %arg4[%c8, %c0_26, %c0_27] : memref<18x64x64xf32, #tpu.memory_space<vmem>>, vector<1x64x64xf32>
    %49 = vector.shape_cast %48 : vector<1x64x64xf32> to vector<64x64xf32>
    %cst_28 = arith.constant dense<0.000000e+00> : vector<8x64xf32>
    %50 = tpu.matmul %47, %49, %cst_28 {dimension_numbers = #tpu.dot_dimension_numbers<[1], [0], [0], [1], [0, 0, 1, 1], [], []>} : vector<8x64xf32>, vector<64x64xf32>, vector<8x64xf32> -> vector<8x64xf32>
    %51 = arith.addf %46, %50 : vector<8x64xf32>
    %52 = vector.extract_strided_slice %43 {offsets = [8, 0], sizes = [8, 64], strides = [1, 1]} : vector<56x64xf32> to vector<8x64xf32>
    %c9 = arith.constant 9 : index
    %c0_29 = arith.constant 0 : index
    %c0_30 = arith.constant 0 : index
    %53 = vector.load %arg4[%c9, %c0_29, %c0_30] : memref<18x64x64xf32, #tpu.memory_space<vmem>>, vector<1x64x64xf32>
    %54 = vector.shape_cast %53 : vector<1x64x64xf32> to vector<64x64xf32>
    %cst_31 = arith.constant dense<0.000000e+00> : vector<8x64xf32>
    %55 = tpu.matmul %52, %54, %cst_31 {dimension_numbers = #tpu.dot_dimension_numbers<[1], [0], [0], [1], [0, 0, 1, 1], [], []>} : vector<8x64xf32>, vector<64x64xf32>, vector<8x64xf32> -> vector<8x64xf32>
    %56 = arith.addf %51, %55 : vector<8x64xf32>
    %57 = vector.extract_strided_slice %43 {offsets = [16, 0], sizes = [8, 64], strides = [1, 1]} : vector<56x64xf32> to vector<8x64xf32>
    %c10 = arith.constant 10 : index
    %c0_32 = arith.constant 0 : index
    %c0_33 = arith.constant 0 : index
    %58 = vector.load %arg4[%c10, %c0_32, %c0_33] : memref<18x64x64xf32, #tpu.memory_space<vmem>>, vector<1x64x64xf32>
    %59 = vector.shape_cast %58 : vector<1x64x64xf32> to vector<64x64xf32>
    %cst_34 = arith.constant dense<0.000000e+00> : vector<8x64xf32>
    %60 = tpu.matmul %57, %59, %cst_34 {dimension_numbers = #tpu.dot_dimension_numbers<[1], [0], [0], [1], [0, 0, 1, 1], [], []>} : vector<8x64xf32>, vector<64x64xf32>, vector<8x64xf32> -> vector<8x64xf32>
    %61 = arith.addf %56, %60 : vector<8x64xf32>
    %62 = vector.extract_strided_slice %43 {offsets = [32, 0], sizes = [8, 64], strides = [1, 1]} : vector<56x64xf32> to vector<8x64xf32>
    %c11 = arith.constant 11 : index
    %c0_35 = arith.constant 0 : index
    %c0_36 = arith.constant 0 : index
    %63 = vector.load %arg4[%c11, %c0_35, %c0_36] : memref<18x64x64xf32, #tpu.memory_space<vmem>>, vector<1x64x64xf32>
    %64 = vector.shape_cast %63 : vector<1x64x64xf32> to vector<64x64xf32>
    %cst_37 = arith.constant dense<0.000000e+00> : vector<8x64xf32>
    %65 = tpu.matmul %62, %64, %cst_37 {dimension_numbers = #tpu.dot_dimension_numbers<[1], [0], [0], [1], [0, 0, 1, 1], [], []>} : vector<8x64xf32>, vector<64x64xf32>, vector<8x64xf32> -> vector<8x64xf32>
    %66 = arith.addf %61, %65 : vector<8x64xf32>
    %67 = vector.extract_strided_slice %43 {offsets = [40, 0], sizes = [8, 64], strides = [1, 1]} : vector<56x64xf32> to vector<8x64xf32>
    %c12 = arith.constant 12 : index
    %c0_38 = arith.constant 0 : index
    %c0_39 = arith.constant 0 : index
    %68 = vector.load %arg4[%c12, %c0_38, %c0_39] : memref<18x64x64xf32, #tpu.memory_space<vmem>>, vector<1x64x64xf32>
    %69 = vector.shape_cast %68 : vector<1x64x64xf32> to vector<64x64xf32>
    %cst_40 = arith.constant dense<0.000000e+00> : vector<8x64xf32>
    %70 = tpu.matmul %67, %69, %cst_40 {dimension_numbers = #tpu.dot_dimension_numbers<[1], [0], [0], [1], [0, 0, 1, 1], [], []>} : vector<8x64xf32>, vector<64x64xf32>, vector<8x64xf32> -> vector<8x64xf32>
    %71 = arith.addf %66, %70 : vector<8x64xf32>
    %72 = vector.extract_strided_slice %43 {offsets = [48, 0], sizes = [8, 64], strides = [1, 1]} : vector<56x64xf32> to vector<8x64xf32>
    %c13 = arith.constant 13 : index
    %c0_41 = arith.constant 0 : index
    %c0_42 = arith.constant 0 : index
    %73 = vector.load %arg4[%c13, %c0_41, %c0_42] : memref<18x64x64xf32, #tpu.memory_space<vmem>>, vector<1x64x64xf32>
    %74 = vector.shape_cast %73 : vector<1x64x64xf32> to vector<64x64xf32>
    %cst_43 = arith.constant dense<0.000000e+00> : vector<8x64xf32>
    %75 = tpu.matmul %72, %74, %cst_43 {dimension_numbers = #tpu.dot_dimension_numbers<[1], [0], [0], [1], [0, 0, 1, 1], [], []>} : vector<8x64xf32>, vector<64x64xf32>, vector<8x64xf32> -> vector<8x64xf32>
    %76 = arith.addf %71, %75 : vector<8x64xf32>
    %c64 = arith.constant 64 : index
    %c0_44 = arith.constant 0 : index
    %77 = vector.load %arg3[%c64, %c0_44] : memref<184x64xf32, #tpu.memory_space<vmem>>, vector<8x64xf32>
    %c72 = arith.constant 72 : index
    %c0_45 = arith.constant 0 : index
    %78 = vector.load %arg3[%c72, %c0_45] : memref<184x64xf32, #tpu.memory_space<vmem>>, vector<8x64xf32>
    %79 = arith.mulf %77, %76 : vector<8x64xf32>
    %80 = math.sin %79 : vector<8x64xf32>
    %81 = arith.mulf %80, %80 : vector<8x64xf32>
    %82 = arith.mulf %78, %81 : vector<8x64xf32>
    %83 = arith.addf %76, %82 : vector<8x64xf32>
    %c200 = arith.constant 200 : index
    %c0_46 = arith.constant 0 : index
    %84 = vector.load %arg2[%c200, %c0_46] : memref<224x16xf32, #tpu.memory_space<vmem>>, vector<8x8xf32>
    %cst_47 = arith.constant dense<0.000000e+00> : vector<8x64xf32>
    %85 = tpu.matmul %84, %83, %cst_47 {dimension_numbers = #tpu.dot_dimension_numbers<[1], [0], [0], [1], [0, 0, 1, 1], [], []>} : vector<8x8xf32>, vector<8x64xf32>, vector<8x64xf32> -> vector<8x64xf32>
    %86 = arith.addf %34, %85 : vector<8x64xf32>
    %c80 = arith.constant 80 : index
    %c0_48 = arith.constant 0 : index
    %87 = vector.load %arg3[%c80, %c0_48] : memref<184x64xf32, #tpu.memory_space<vmem>>, vector<8x64xf32>
    %88 = arith.addf %86, %87 : vector<8x64xf32>
    %c88 = arith.constant 88 : index
    %c0_49 = arith.constant 0 : index
    %89 = vector.load %arg3[%c88, %c0_49] : memref<184x64xf32, #tpu.memory_space<vmem>>, vector<8x64xf32>
    %c96 = arith.constant 96 : index
    %c0_50 = arith.constant 0 : index
    %90 = vector.load %arg3[%c96, %c0_50] : memref<184x64xf32, #tpu.memory_space<vmem>>, vector<8x64xf32>
    %91 = arith.mulf %89, %88 : vector<8x64xf32>
    %92 = math.sin %91 : vector<8x64xf32>
    %93 = arith.mulf %92, %92 : vector<8x64xf32>
    %94 = arith.mulf %90, %93 : vector<8x64xf32>
    %95 = arith.addf %88, %94 : vector<8x64xf32>
    %c88_51 = arith.constant 88 : index
    %c0_52 = arith.constant 0 : index
    %96 = vector.load %arg2[%c88_51, %c0_52] : memref<224x16xf32, #tpu.memory_space<vmem>>, vector<56x8xf32>
    %cst_53 = arith.constant dense<0.000000e+00> : vector<56x64xf32>
    %97 = tpu.matmul %96, %95, %cst_53 {dimension_numbers = #tpu.dot_dimension_numbers<[1], [0], [0], [1], [0, 0, 1, 1], [], []>} : vector<56x8xf32>, vector<8x64xf32>, vector<56x64xf32> -> vector<56x64xf32>
    %c104 = arith.constant 104 : index
    %c0_54 = arith.constant 0 : index
    %98 = vector.load %arg3[%c104, %c0_54] : memref<184x64xf32, #tpu.memory_space<vmem>>, vector<8x64xf32>
    %99 = vector.extract_strided_slice %97 {offsets = [24, 0], sizes = [8, 64], strides = [1, 1]} : vector<56x64xf32> to vector<8x64xf32>
    %100 = arith.addf %98, %99 : vector<8x64xf32>
    %101 = vector.extract_strided_slice %97 {offsets = [0, 0], sizes = [8, 64], strides = [1, 1]} : vector<56x64xf32> to vector<8x64xf32>
    %c6 = arith.constant 6 : index
    %c0_55 = arith.constant 0 : index
    %c0_56 = arith.constant 0 : index
    %102 = vector.load %arg4[%c6, %c0_55, %c0_56] : memref<18x64x64xf32, #tpu.memory_space<vmem>>, vector<1x64x64xf32>
    %103 = vector.shape_cast %102 : vector<1x64x64xf32> to vector<64x64xf32>
    %cst_57 = arith.constant dense<0.000000e+00> : vector<8x64xf32>
    %104 = tpu.matmul %101, %103, %cst_57 {dimension_numbers = #tpu.dot_dimension_numbers<[1], [0], [0], [1], [0, 0, 1, 1], [], []>} : vector<8x64xf32>, vector<64x64xf32>, vector<8x64xf32> -> vector<8x64xf32>
    %105 = arith.addf %100, %104 : vector<8x64xf32>
    %106 = vector.extract_strided_slice %97 {offsets = [8, 0], sizes = [8, 64], strides = [1, 1]} : vector<56x64xf32> to vector<8x64xf32>
    %c7 = arith.constant 7 : index
    %c0_58 = arith.constant 0 : index
    %c0_59 = arith.constant 0 : index
    %107 = vector.load %arg4[%c7, %c0_58, %c0_59] : memref<18x64x64xf32, #tpu.memory_space<vmem>>, vector<1x64x64xf32>
    %108 = vector.shape_cast %107 : vector<1x64x64xf32> to vector<64x64xf32>
    %cst_60 = arith.constant dense<0.000000e+00> : vector<8x64xf32>
    %109 = tpu.matmul %106, %108, %cst_60 {dimension_numbers = #tpu.dot_dimension_numbers<[1], [0], [0], [1], [0, 0, 1, 1], [], []>} : vector<8x64xf32>, vector<64x64xf32>, vector<8x64xf32> -> vector<8x64xf32>
    %110 = arith.addf %105, %109 : vector<8x64xf32>
    %111 = vector.extract_strided_slice %97 {offsets = [16, 0], sizes = [8, 64], strides = [1, 1]} : vector<56x64xf32> to vector<8x64xf32>
    %c8_61 = arith.constant 8 : index
    %c0_62 = arith.constant 0 : index
    %c0_63 = arith.constant 0 : index
    %112 = vector.load %arg4[%c8_61, %c0_62, %c0_63] : memref<18x64x64xf32, #tpu.memory_space<vmem>>, vector<1x64x64xf32>
    %113 = vector.shape_cast %112 : vector<1x64x64xf32> to vector<64x64xf32>
    %cst_64 = arith.constant dense<0.000000e+00> : vector<8x64xf32>
    %114 = tpu.matmul %111, %113, %cst_64 {dimension_numbers = #tpu.dot_dimension_numbers<[1], [0], [0], [1], [0, 0, 1, 1], [], []>} : vector<8x64xf32>, vector<64x64xf32>, vector<8x64xf32> -> vector<8x64xf32>
    %115 = arith.addf %110, %114 : vector<8x64xf32>
    %116 = vector.extract_strided_slice %97 {offsets = [32, 0], sizes = [8, 64], strides = [1, 1]} : vector<56x64xf32> to vector<8x64xf32>
    %c13_65 = arith.constant 13 : index
    %c0_66 = arith.constant 0 : index
    %c0_67 = arith.constant 0 : index
    %117 = vector.load %arg4[%c13_65, %c0_66, %c0_67] : memref<18x64x64xf32, #tpu.memory_space<vmem>>, vector<1x64x64xf32>
    %118 = vector.shape_cast %117 : vector<1x64x64xf32> to vector<64x64xf32>
    %cst_68 = arith.constant dense<0.000000e+00> : vector<8x64xf32>
    %119 = tpu.matmul %116, %118, %cst_68 {dimension_numbers = #tpu.dot_dimension_numbers<[1], [0], [0], [1], [0, 0, 1, 1], [], []>} : vector<8x64xf32>, vector<64x64xf32>, vector<8x64xf32> -> vector<8x64xf32>
    %120 = arith.addf %115, %119 : vector<8x64xf32>
    %121 = vector.extract_strided_slice %97 {offsets = [40, 0], sizes = [8, 64], strides = [1, 1]} : vector<56x64xf32> to vector<8x64xf32>
    %c14 = arith.constant 14 : index
    %c0_69 = arith.constant 0 : index
    %c0_70 = arith.constant 0 : index
    %122 = vector.load %arg4[%c14, %c0_69, %c0_70] : memref<18x64x64xf32, #tpu.memory_space<vmem>>, vector<1x64x64xf32>
    %123 = vector.shape_cast %122 : vector<1x64x64xf32> to vector<64x64xf32>
    %cst_71 = arith.constant dense<0.000000e+00> : vector<8x64xf32>
    %124 = tpu.matmul %121, %123, %cst_71 {dimension_numbers = #tpu.dot_dimension_numbers<[1], [0], [0], [1], [0, 0, 1, 1], [], []>} : vector<8x64xf32>, vector<64x64xf32>, vector<8x64xf32> -> vector<8x64xf32>
    %125 = arith.addf %120, %124 : vector<8x64xf32>
    %126 = vector.extract_strided_slice %97 {offsets = [48, 0], sizes = [8, 64], strides = [1, 1]} : vector<56x64xf32> to vector<8x64xf32>
    %c15 = arith.constant 15 : index
    %c0_72 = arith.constant 0 : index
    %c0_73 = arith.constant 0 : index
    %127 = vector.load %arg4[%c15, %c0_72, %c0_73] : memref<18x64x64xf32, #tpu.memory_space<vmem>>, vector<1x64x64xf32>
    %128 = vector.shape_cast %127 : vector<1x64x64xf32> to vector<64x64xf32>
    %cst_74 = arith.constant dense<0.000000e+00> : vector<8x64xf32>
    %129 = tpu.matmul %126, %128, %cst_74 {dimension_numbers = #tpu.dot_dimension_numbers<[1], [0], [0], [1], [0, 0, 1, 1], [], []>} : vector<8x64xf32>, vector<64x64xf32>, vector<8x64xf32> -> vector<8x64xf32>
    %130 = arith.addf %125, %129 : vector<8x64xf32>
    %c112 = arith.constant 112 : index
    %c0_75 = arith.constant 0 : index
    %131 = vector.load %arg3[%c112, %c0_75] : memref<184x64xf32, #tpu.memory_space<vmem>>, vector<8x64xf32>
    %c120 = arith.constant 120 : index
    %c0_76 = arith.constant 0 : index
    %132 = vector.load %arg3[%c120, %c0_76] : memref<184x64xf32, #tpu.memory_space<vmem>>, vector<8x64xf32>
    %133 = arith.mulf %131, %130 : vector<8x64xf32>
    %134 = math.sin %133 : vector<8x64xf32>
    %135 = arith.mulf %134, %134 : vector<8x64xf32>
    %136 = arith.mulf %132, %135 : vector<8x64xf32>
    %137 = arith.addf %130, %136 : vector<8x64xf32>
    %c208 = arith.constant 208 : index
    %c0_77 = arith.constant 0 : index
    %138 = vector.load %arg2[%c208, %c0_77] : memref<224x16xf32, #tpu.memory_space<vmem>>, vector<8x8xf32>
    %cst_78 = arith.constant dense<0.000000e+00> : vector<8x64xf32>
    %139 = tpu.matmul %138, %137, %cst_78 {dimension_numbers = #tpu.dot_dimension_numbers<[1], [0], [0], [1], [0, 0, 1, 1], [], []>} : vector<8x8xf32>, vector<8x64xf32>, vector<8x64xf32> -> vector<8x64xf32>
    %140 = arith.addf %88, %139 : vector<8x64xf32>
    %c128 = arith.constant 128 : index
    %c0_79 = arith.constant 0 : index
    %141 = vector.load %arg3[%c128, %c0_79] : memref<184x64xf32, #tpu.memory_space<vmem>>, vector<8x64xf32>
    %142 = arith.addf %140, %141 : vector<8x64xf32>
    %c136 = arith.constant 136 : index
    %c0_80 = arith.constant 0 : index
    %143 = vector.load %arg3[%c136, %c0_80] : memref<184x64xf32, #tpu.memory_space<vmem>>, vector<8x64xf32>
    %c144 = arith.constant 144 : index
    %c0_81 = arith.constant 0 : index
    %144 = vector.load %arg3[%c144, %c0_81] : memref<184x64xf32, #tpu.memory_space<vmem>>, vector<8x64xf32>
    %145 = arith.mulf %143, %142 : vector<8x64xf32>
    %146 = math.sin %145 : vector<8x64xf32>
    %147 = arith.mulf %146, %146 : vector<8x64xf32>
    %148 = arith.mulf %144, %147 : vector<8x64xf32>
    %149 = arith.addf %142, %148 : vector<8x64xf32>
    %c144_82 = arith.constant 144 : index
    %c0_83 = arith.constant 0 : index
    %150 = vector.load %arg2[%c144_82, %c0_83] : memref<224x16xf32, #tpu.memory_space<vmem>>, vector<56x8xf32>
    %cst_84 = arith.constant dense<0.000000e+00> : vector<56x64xf32>
    %151 = tpu.matmul %150, %149, %cst_84 {dimension_numbers = #tpu.dot_dimension_numbers<[1], [0], [0], [1], [0, 0, 1, 1], [], []>} : vector<56x8xf32>, vector<8x64xf32>, vector<56x64xf32> -> vector<56x64xf32>
    %c152 = arith.constant 152 : index
    %c0_85 = arith.constant 0 : index
    %152 = vector.load %arg3[%c152, %c0_85] : memref<184x64xf32, #tpu.memory_space<vmem>>, vector<8x64xf32>
    %153 = vector.extract_strided_slice %151 {offsets = [24, 0], sizes = [8, 64], strides = [1, 1]} : vector<56x64xf32> to vector<8x64xf32>
    %154 = arith.addf %152, %153 : vector<8x64xf32>
    %155 = vector.extract_strided_slice %151 {offsets = [0, 0], sizes = [8, 64], strides = [1, 1]} : vector<56x64xf32> to vector<8x64xf32>
    %c4 = arith.constant 4 : index
    %c0_86 = arith.constant 0 : index
    %c0_87 = arith.constant 0 : index
    %156 = vector.load %arg4[%c4, %c0_86, %c0_87] : memref<18x64x64xf32, #tpu.memory_space<vmem>>, vector<1x64x64xf32>
    %157 = vector.shape_cast %156 : vector<1x64x64xf32> to vector<64x64xf32>
    %cst_88 = arith.constant dense<0.000000e+00> : vector<8x64xf32>
    %158 = tpu.matmul %155, %157, %cst_88 {dimension_numbers = #tpu.dot_dimension_numbers<[1], [0], [0], [1], [0, 0, 1, 1], [], []>} : vector<8x64xf32>, vector<64x64xf32>, vector<8x64xf32> -> vector<8x64xf32>
    %159 = arith.addf %154, %158 : vector<8x64xf32>
    %160 = vector.extract_strided_slice %151 {offsets = [8, 0], sizes = [8, 64], strides = [1, 1]} : vector<56x64xf32> to vector<8x64xf32>
    %c5 = arith.constant 5 : index
    %c0_89 = arith.constant 0 : index
    %c0_90 = arith.constant 0 : index
    %161 = vector.load %arg4[%c5, %c0_89, %c0_90] : memref<18x64x64xf32, #tpu.memory_space<vmem>>, vector<1x64x64xf32>
    %162 = vector.shape_cast %161 : vector<1x64x64xf32> to vector<64x64xf32>
    %cst_91 = arith.constant dense<0.000000e+00> : vector<8x64xf32>
    %163 = tpu.matmul %160, %162, %cst_91 {dimension_numbers = #tpu.dot_dimension_numbers<[1], [0], [0], [1], [0, 0, 1, 1], [], []>} : vector<8x64xf32>, vector<64x64xf32>, vector<8x64xf32> -> vector<8x64xf32>
    %164 = arith.addf %159, %163 : vector<8x64xf32>
    %165 = vector.extract_strided_slice %151 {offsets = [16, 0], sizes = [8, 64], strides = [1, 1]} : vector<56x64xf32> to vector<8x64xf32>
    %c6_92 = arith.constant 6 : index
    %c0_93 = arith.constant 0 : index
    %c0_94 = arith.constant 0 : index
    %166 = vector.load %arg4[%c6_92, %c0_93, %c0_94] : memref<18x64x64xf32, #tpu.memory_space<vmem>>, vector<1x64x64xf32>
    %167 = vector.shape_cast %166 : vector<1x64x64xf32> to vector<64x64xf32>
    %cst_95 = arith.constant dense<0.000000e+00> : vector<8x64xf32>
    %168 = tpu.matmul %165, %167, %cst_95 {dimension_numbers = #tpu.dot_dimension_numbers<[1], [0], [0], [1], [0, 0, 1, 1], [], []>} : vector<8x64xf32>, vector<64x64xf32>, vector<8x64xf32> -> vector<8x64xf32>
    %169 = arith.addf %164, %168 : vector<8x64xf32>
    %170 = vector.extract_strided_slice %151 {offsets = [32, 0], sizes = [8, 64], strides = [1, 1]} : vector<56x64xf32> to vector<8x64xf32>
    %c15_96 = arith.constant 15 : index
    %c0_97 = arith.constant 0 : index
    %c0_98 = arith.constant 0 : index
    %171 = vector.load %arg4[%c15_96, %c0_97, %c0_98] : memref<18x64x64xf32, #tpu.memory_space<vmem>>, vector<1x64x64xf32>
    %172 = vector.shape_cast %171 : vector<1x64x64xf32> to vector<64x64xf32>
    %cst_99 = arith.constant dense<0.000000e+00> : vector<8x64xf32>
    %173 = tpu.matmul %170, %172, %cst_99 {dimension_numbers = #tpu.dot_dimension_numbers<[1], [0], [0], [1], [0, 0, 1, 1], [], []>} : vector<8x64xf32>, vector<64x64xf32>, vector<8x64xf32> -> vector<8x64xf32>
    %174 = arith.addf %169, %173 : vector<8x64xf32>
    %175 = vector.extract_strided_slice %151 {offsets = [40, 0], sizes = [8, 64], strides = [1, 1]} : vector<56x64xf32> to vector<8x64xf32>
    %c16_100 = arith.constant 16 : index
    %c0_101 = arith.constant 0 : index
    %c0_102 = arith.constant 0 : index
    %176 = vector.load %arg4[%c16_100, %c0_101, %c0_102] : memref<18x64x64xf32, #tpu.memory_space<vmem>>, vector<1x64x64xf32>
    %177 = vector.shape_cast %176 : vector<1x64x64xf32> to vector<64x64xf32>
    %cst_103 = arith.constant dense<0.000000e+00> : vector<8x64xf32>
    %178 = tpu.matmul %175, %177, %cst_103 {dimension_numbers = #tpu.dot_dimension_numbers<[1], [0], [0], [1], [0, 0, 1, 1], [], []>} : vector<8x64xf32>, vector<64x64xf32>, vector<8x64xf32> -> vector<8x64xf32>
    %179 = arith.addf %174, %178 : vector<8x64xf32>
    %180 = vector.extract_strided_slice %151 {offsets = [48, 0], sizes = [8, 64], strides = [1, 1]} : vector<56x64xf32> to vector<8x64xf32>
    %c17 = arith.constant 17 : index
    %c0_104 = arith.constant 0 : index
    %c0_105 = arith.constant 0 : index
    %181 = vector.load %arg4[%c17, %c0_104, %c0_105] : memref<18x64x64xf32, #tpu.memory_space<vmem>>, vector<1x64x64xf32>
    %182 = vector.shape_cast %181 : vector<1x64x64xf32> to vector<64x64xf32>
    %cst_106 = arith.constant dense<0.000000e+00> : vector<8x64xf32>
    %183 = tpu.matmul %180, %182, %cst_106 {dimension_numbers = #tpu.dot_dimension_numbers<[1], [0], [0], [1], [0, 0, 1, 1], [], []>} : vector<8x64xf32>, vector<64x64xf32>, vector<8x64xf32> -> vector<8x64xf32>
    %184 = arith.addf %179, %183 : vector<8x64xf32>
    %c160 = arith.constant 160 : index
    %c0_107 = arith.constant 0 : index
    %185 = vector.load %arg3[%c160, %c0_107] : memref<184x64xf32, #tpu.memory_space<vmem>>, vector<8x64xf32>
    %c168 = arith.constant 168 : index
    %c0_108 = arith.constant 0 : index
    %186 = vector.load %arg3[%c168, %c0_108] : memref<184x64xf32, #tpu.memory_space<vmem>>, vector<8x64xf32>
    %187 = arith.mulf %185, %184 : vector<8x64xf32>
    %188 = math.sin %187 : vector<8x64xf32>
    %189 = arith.mulf %188, %188 : vector<8x64xf32>
    %190 = arith.mulf %186, %189 : vector<8x64xf32>
    %191 = arith.addf %184, %190 : vector<8x64xf32>
    %c216 = arith.constant 216 : index
    %c0_109 = arith.constant 0 : index
    %192 = vector.load %arg2[%c216, %c0_109] : memref<224x16xf32, #tpu.memory_space<vmem>>, vector<8x8xf32>
    %cst_110 = arith.constant dense<0.000000e+00> : vector<8x64xf32>
    %193 = tpu.matmul %192, %191, %cst_110 {dimension_numbers = #tpu.dot_dimension_numbers<[1], [0], [0], [1], [0, 0, 1, 1], [], []>} : vector<8x8xf32>, vector<8x64xf32>, vector<8x64xf32> -> vector<8x64xf32>
    %194 = arith.addf %142, %193 : vector<8x64xf32>
    %c176 = arith.constant 176 : index
    %c0_111 = arith.constant 0 : index
    %195 = vector.load %arg3[%c176, %c0_111] : memref<184x64xf32, #tpu.memory_space<vmem>>, vector<8x64xf32>
    %196 = arith.addf %194, %195 : vector<8x64xf32>
    %c0_112 = arith.constant 0 : index
    %c0_113 = arith.constant 0 : index
    %197 = vector.load %arg5[%c0_112, %c0_113] : memref<8x64xf32, #tpu.memory_space<vmem>>, vector<8x64xf32>
    tpu.vector_store %arg5[%c0_112, %c0_113], %196 {strides = array<i32>} : memref<8x64xf32, #tpu.memory_space<vmem>>, vector<8x64xf32>,
    return
  }
  func.func @transform_0(%arg0: i32) -> (i32, i32) {
    %c0_i32 = arith.constant 0 : i32
    %c0_i32_0 = arith.constant 0 : i32
    %c0_i32_1 = arith.constant 0 : i32
    return %c0_i32, %c0_i32_0 : i32, i32
  }
  func.func @transform_1(%arg0: i32) -> (i32, i32) {
    %c0_i32 = arith.constant 0 : i32
    %c0_i32_0 = arith.constant 0 : i32
    %c0_i32_1 = arith.constant 0 : i32
    return %c0_i32, %c0_i32_0 : i32, i32
  }
  func.func @transform_2(%arg0: i32) -> (i32, i32) {
    %c0_i32 = arith.constant 0 : i32
    %c0_i32_0 = arith.constant 0 : i32
    %c0_i32_1 = arith.constant 0 : i32
    return %c0_i32, %c0_i32_0 : i32, i32
  }
  func.func @transform_3(%arg0: i32) -> (i32, i32, i32) {
    %c0_i32 = arith.constant 0 : i32
    %c0_i32_0 = arith.constant 0 : i32
    %c0_i32_1 = arith.constant 0 : i32
    %c0_i32_2 = arith.constant 0 : i32
    return %c0_i32, %c0_i32_0, %c0_i32_1 : i32, i32, i32
  }
  func.func @transform_4(%arg0: i32) -> (i32, i32) {
    %c0_i32 = arith.constant 0 : i32
    %c0_i32_0 = arith.constant 0 : i32
    %c0_i32_1 = arith.constant 0 : i32
    return %c0_i32, %c0_i32_0 : i32, i32
  }
}

</mosaic_0001>

<bundles_post_ra>
// kernel: decoder_block_forward.1
= control target key start
LH: loop header
LB: loop body
LE: loop exit
PB: predicated region body
PF: predicated region fallthrough
CT: control target
= control target key end

     0   :  { %9 = vsyncpa [#allocation3], 0  ;;  %s4590_s15 = smov [#allocation2]   ;;  %s5420_s0 = inlined_call_operand.vmem [shape: f32[16,32], index: 0, kind: input, shape index: {}]   ;;  %s5421_s1 = inlined_call_operand.vmem [shape: f32[224,16], index: 1, kind: input, shape index: {}]   ;;  %s5422_s2 = inlined_call_operand.vmem [shape: f32[184,64], index: 2, kind: input, shape index: {}]   ;;  %s5423_s3 = inlined_call_operand.hbm [shape: f32[18,64,64], index: 3, kind: input, shape index: {}]   ;;  %s5424_s4 = inlined_call_operand.vmem [shape: f32[8,64], index: 4, kind: output, shape index: {}]  }
   0x1   :  { %s21_s16 = sshll.u32 %s4590_s15, 4  ;;  %s4566_s19 = scalar_lea.hbm %s5423_s3, 18432  ;;  %s22_s16 = int_to_ptr.vmem [resolvable:$true] %s21_s16 }
   0x2   :  { %p4567_p0 = scmp.ne.s32.totalorder %s5423_s3, %s4566_s19  ;;  %p4570_p1 = scmp.lt.u32.totalorder %s4566_s19, %s5423_s3 }
   0x4   :  { %p4572_p2 = pnand %p4570_p1, %p4567_p0 }
   0x6   :  { %4575 = shalt.err (!%p4572_p2)
}
   0x7   :  { %s4576_s24 = scalar_lea.vmem %s22_s16, 18432  ;;  %p4581_p4 = scmp.lt.s32.totalorder %s22_s16, %s22_s16 }
   0x8   :  { %p4577_p3 = scmp.ne.s32.totalorder %s22_s16, %s4576_s24  ;;  %p4582_p5 = scmp.lt.s32.totalorder %s4576_s24, %s4576_s24 }
   0xa   :  { %p4583_p6 = por %p4582_p5, %p4581_p4 }
   0xc   :  { %p4584_p7 = pnand %p4583_p6, %p4577_p3 }
   0xe   :  { %4587 = shalt.err (!%p4584_p7)
}
   0xf   :  { %s4591_s25 = smov 128   ;;  %s4592_s26 = smov 8  }
  0x10   :  { %27 = dma.hbm_to_vmem [thread:$0]  %s5423_s3, 18432, %s22_s16, [#allocation3], %s4591_s25, %s4591_s25, %s4592_s26  }
  0x11   :  { %4588 = dma.done.wait [#allocation3], 18432  }
  0x12   :  { %4589 = vsyncadd [#allocation3], 4294948864  ;;  %v4593_v0 = vmov 0.0|0.0   ;;  %v4643_v1 = vld [vmem:[%s5420_s0] sm:$0xff]  ;;  %v4648_v2 = vld [vmem:[%s5420_s0 + $0x8] sm:$0xff]  ;;  %vm257_vm0 = vcmask 130048  }
  0x13   :  { %4203 = vmatprep.subr.bf16.mxu1 %v4593_v0  ;;  %v33_v3 = vld [vmem:[%s5422_s2] sm:$0xff]  ;;  %v34_v4 = vld [vmem:[%s5422_s2 + $0x8] sm:$0xff]  ;;  %v358_v14 = vld [vmem:[#allocation2 + $0x10] sm:$0xff]  ;;  %v4594_v36 = vmov 683565275  }
  0x14   :  { %v4657_v5 = vmul.f32 %v33_v3, %v4643_v1  ;;  %v4660_v6 = vmul.f32 %v34_v4, %v4648_v2  ;;  %v253_v7 = vld [vmem:[%s5421_s1] sm:$0xff]  ;;  %v357_v13 = vld [vmem:[#allocation2 + $0x8] sm:$0xff]  ;;  %v359_v17 = vld [vmem:[#allocation2 + $0x18] sm:$0xff]  ;;  %v4595_v38 = vmov 2475754826  }
  0x15   :  { %3723 = vmatprep.mubr.msk.f32.mxu0 %vm257_vm0, %v253_v7  ;;  %v356_v10 = vld [vmem:[#allocation2] sm:$0xff]  ;;  %v4207_v22 = vpack.c.bf16 %v359_v17, %v358_v14  ;;  %v4596_v40 = vmov 2131351028   ;;  %v4597_v42 = vmov 2102212464  }
  0x16   :  { %v39_v8 = vand.u32 2147483647, %v4657_v5  ;;  %v42_v9 = vand.u32 2139095040, %v4657_v5  ;;  %v143_v11 = vand.u32 2147483647, %v4660_v6  ;;  %v146_v12 = vand.u32 2139095040, %v4660_v6 }
  0x17   :  { %v4204_v16 = vpack.c.bf16 %v357_v13, %v356_v10  ;;  %v4598_v44 = vmov 920167782   ;;  %v4599_v52 = vmov 1326507024   ;;  %vm41_vm15 = vcmp.lt.s32.totalorder %v4657_v5, 0 }
  0x18   :  { %v43_v15 = vshrl.u32 %v42_v9, 23  ;;  %v46_v18 = vand.u32 8388607, %v39_v8  ;;  %v147_v19 = vshrl.u32 %v146_v12, 23  ;;  %v150_v20 = vand.u32 8388607, %v143_v11 }
  0x19   :  { %4205 = vmatpush3.bf16.msra.mxu1 %v4204_v16 }
  0x1a   :  { %v3419_v21 = vadd.s32 4294967169, %v43_v15  ;;  %v3423_v23 = vadd.s32 4294967169, %v147_v19  ;;  %4206 = vmatprep.subr.bf16.mxu1 %v4593_v0  ;;  %v47_v25 = vor.u32 8388608, %v46_v18  ;;  %v151_v26 = vor.u32 8388608, %v150_v20 }
  0x1c   :  { %v49_v24 = vadd.s32 1, %v3419_v21  ;;  %v153_v27 = vadd.s32 1, %v3423_v23  ;;  %v4676_v32 = vshll.u32 %v47_v25, 8  ;;  %v4678_v34 = vshll.u32 %v151_v26, 8 }
  0x1d   :  { %4208 = vmatpush3.bf16.msra.mxu1 %v4207_v22 }
  0x1e   :  { %vm50_vm1 = vcmp.gt.s32.totalorder %v49_v24, 0  ;;  %vm154_vm2 = vcmp.gt.s32.totalorder %v153_v27, 0  ;;  %4209 = vmatprep.subr.bf16.mxu1 %v4593_v0 }
  0x1f   :  { %v51_v28 = vsel %vm50_vm1, %v49_v24, 0  ;;  %v155_v31 = vsel %vm154_vm2, %v153_v27, 0  ;;  %vm40_vm1 = vcmp.le.f32.partialorder %v39_v8, 0.7853982  ;;  %vm145_vm2 = vcmp.lt.s32.totalorder %v4660_v6, 0 }
  0x20   :  { %v52_v29 = vshrl.u32 %v51_v28, 5  ;;  %v53_v30 = vand.u32 31, %v51_v28  ;;  %v157_v33 = vand.u32 31, %v155_v31  ;;  %v4685_v46 = vshrl.u32 %v155_v31, 5 }
  0x22   :  { %v54_v35 = vsub.s32 32, %v53_v30  ;;  %v56_v37 = vshll.u32 %v4594_v36, %v53_v30  ;;  %v59_v39 = vshll.u32 %v4595_v38, %v53_v30  ;;  %v62_v41 = vshll.u32 %v4596_v40, %v53_v30 }
  0x23   :  { %v65_v43 = vshll.u32 %v4597_v42, %v53_v30  ;;  %v68_v45 = vshll.u32 %v4598_v44, %v53_v30  ;;  %vm71_vm3 = vcmp.lt.s32.totalorder %v52_v29, 1  ;;  %vm72_vm4 = vcmp.lt.s32.totalorder %v52_v29, 2 }
  0x24   :  { %v55_v47 = vshrl.u32 %v4594_v36, %v54_v35  ;;  %v57_v48 = vshrl.u32 %v4595_v38, %v54_v35  ;;  %v60_v49 = vshrl.u32 %v4596_v40, %v54_v35  ;;  %v63_v50 = vshrl.u32 %v4597_v42, %v54_v35 }
  0x25   :  { %v66_v51 = vshrl.u32 %v4598_v44, %v54_v35  ;;  %v69_v53 = vshrl.u32 %v4599_v52, %v54_v35  ;;  %vm74_vm5 = vcmp.lt.s32.totalorder %v52_v29, 4  ;;  %v158_v57 = vsub.s32 32, %v157_v33 }
  0x26   :  { %v58_v54 = vor.u32 %v57_v48, %v56_v37  ;;  %v61_v55 = vor.u32 %v60_v49, %v59_v39  ;;  %v64_v56 = vor.u32 %v63_v50, %v62_v41  ;;  %vm73_vm6 = vcmp.lt.s32.totalorder %v52_v29, 3 }
  0x27   :  { %v67_v58 = vor.u32 %v66_v51, %v65_v43  ;;  %v70_v59 = vor.u32 %v69_v53, %v68_v45  ;;  %v160_v60 = vshll.u32 %v4594_v36, %v157_v33  ;;  %v163_v10 = vshll.u32 %v4595_v38, %v157_v33 }
  0x28   :  { %v75_v61 = vsel %vm71_vm3, %v55_v47, %v58_v54  ;;  %v76_v62 = vsel %vm74_vm5, %v64_v56, 2102212464  ;;  %v79_v63 = vsel %vm71_vm3, %v58_v54, %v61_v55  ;;  %v83_v3 = vsel %vm71_vm3, %v61_v55, %v64_v56 }
  0x29   :  { %v77_v4 = vsel %vm73_vm6, %v61_v55, %v76_v62  ;;  %v80_v7 = vsel %vm74_vm5, %v67_v58, 920167782  ;;  %v84_v9 = vsel %vm74_vm5, %v70_v59, 1326507024  ;;  %v159_v14 = vshrl.u32 %v4594_v36, %v158_v57 }
  0x2a   :  { %v81_v12 = vsel %vm73_vm6, %v64_v56, %v80_v7  ;;  %v85_v13 = vsel %vm73_vm6, %v67_v58, %v84_v9  ;;  %v161_v15 = vshrl.u32 %v4595_v38, %v158_v57  ;;  %v78_v16 = vsel %vm72_vm4, %v75_v61, %v77_v4 }
  0x2b   :  { %v82_v17 = vsel %vm72_vm4, %v79_v63, %v81_v12  ;;  %v86_v18 = vsel %vm72_vm4, %v83_v3, %v85_v13  ;;  %v164_v19 = vshrl.u32 %v4596_v40, %v158_v57  ;;  %v166_v26 = vshll.u32 %v4596_v40, %v157_v33 }
  0x2c   :  { %v4705_v20 = vmul.u32.u64.low %v4676_v32, %v86_v18  ;;  %v4706_v21 = vmul.u32.u64.high %v4676_v32, %v86_v18, %v4705_v20  ;;  %v4709_v22 = vmul.u32.u64.low %v4676_v32, %v82_v17  ;;  %v4710_v23 = vmul.u32.u64.high %v4676_v32, %v82_v17, %v4709_v22 }
  0x2d   :  { %v162_v24 = vor.u32 %v161_v15, %v160_v60  ;;  %v165_v25 = vor.u32 %v164_v19, %v163_v10  ;;  %v167_v27 = vshrl.u32 %v4597_v42, %v158_v57  ;;  %v169_v28 = vshll.u32 %v4597_v42, %v157_v33 }
  0x2e   :  { %v170_v29 = vshrl.u32 %v4598_v44, %v158_v57  ;;  %v172_v30 = vshll.u32 %v4598_v44, %v157_v33  ;;  %v173_v31 = vshrl.u32 %v4599_v52, %v158_v57  ;;  %v94_v35 = vmul.u32 %v4676_v32, %v78_v16 }
  0x2f   :  { %v168_v37 = vor.u32 %v167_v27, %v166_v26  ;;  %vm175_vm7 = vcmp.lt.s32.totalorder %v4685_v46, 1  ;;  %vm176_vm8 = vcmp.lt.s32.totalorder %v4685_v46, 2  ;;  %vm96_vm9 = vc.u32 %v4706_v21, %v4709_v22 }
  0x30   :  { %v97_v39 = vadd.s32 1, %v4710_v23  ;;  %v171_v41 = vor.u32 %v170_v29, %v169_v28  ;;  %vm177_vm10 = vcmp.lt.s32.totalorder %v4685_v46, 3  ;;  %v174_v43 = vor.u32 %v173_v31, %v172_v30 }
  0x31   :  { %vm178_vm11 = vcmp.lt.s32.totalorder %v4685_v46, 4  ;;  %v179_v33 = vsel %vm175_vm7, %v159_v14, %v162_v24  ;;  %v183_v45 = vsel %vm175_vm7, %v162_v24, %v165_v25  ;;  %v187_v49 = vsel %vm175_vm7, %v165_v25, %v168_v37 }
  0x32   :  { %v98_v47 = vsel %vm96_vm9, %v97_v39, %v4710_v23  ;;  %v180_v32 = vsel %vm178_vm11, %v168_v37, 2102212464  ;;  %v184_v48 = vsel %vm178_vm11, %v171_v41, 920167782  ;;  %v188_v54 = vsel %vm178_vm11, %v174_v43, 1326507024 }
  0x33   :  { %v99_v50 = vadd.s32 %v98_v47, %v94_v35  ;;  %v181_v51 = vsel %vm177_vm10, %v165_v25, %v180_v32  ;;  %v185_v53 = vsel %vm177_vm10, %v168_v37, %v184_v48  ;;  %v189_v57 = vsel %vm177_vm10, %v171_v41, %v188_v54 }
  0x34   :  { %v182_v55 = vsel %vm176_vm8, %v179_v33, %v181_v51  ;;  %v186_v56 = vsel %vm176_vm8, %v183_v45, %v185_v53  ;;  %v190_v59 = vsel %vm176_vm8, %v187_v49, %v189_v57  ;;  %v95_v23 = vadd.s32 %v4709_v22, %v4706_v21 }
  0x35   :  { %v100_v58 = vadd.s32 536870912, %v99_v50  ;;  %v4733_v60 = vmul.u32.u64.low %v4678_v34, %v186_v56  ;;  %v4734_v61 = vmul.u32.u64.high %v4678_v34, %v186_v56, %v4733_v60  ;;  %v198_v4 = vmul.u32 %v4678_v34, %v182_v55 }
  0x36   :  { %v4737_v62 = vmul.u32.u64.low %v4678_v34, %v190_v59  ;;  %v4738_v63 = vmul.u32.u64.high %v4678_v34, %v190_v59, %v4737_v62  ;;  %vm144_vm3 = vcmp.le.f32.partialorder %v143_v11, 0.7853982  ;;  %vm131_vm7 = vweird.f32 %v4657_v5 }
  0x37   :  { %v101_v3 = vshrl.u32 %v100_v58, 30  ;;  %v201_v9 = vadd.s32 1, %v4734_v61  ;;  %vm235_vm11 = vweird.f32 %v4660_v6 }
  0x38   :  { %vm200_vm12 = vc.u32 %v4738_v63, %v4733_v60  ;;  %v199_v33 = vadd.s32 %v4733_v60, %v4738_v63 }
  0x39   :  { %v102_v7 = vshll.u32 %v101_v3, 30  ;;  %v202_v46 = vsel %vm200_vm12, %v201_v9, %v4734_v61  ;;  %v125_v21 = vsub.s32 4, %v101_v3  ;;  %vm4600_vm12 = vmmov 0  }
  0x3a   :  { %v203_v12 = vadd.s32 %v202_v46, %v198_v4 }
  0x3b   :  { %v103_v10 = vsub.s32 %v99_v50, %v102_v7  ;;  %v126_v54 = vsel %vm41_vm15, %v125_v21, %v101_v3  ;;  %v255_v21 = vld [vmem:[%s5421_s1 + $0x10] sm:$0xff] }
  0x3c   :  { %v204_v14 = vadd.s32 536870912, %v203_v12  ;;  %v128_v59 = vsel %vm40_vm1, 0, %v126_v54  ;;  %v515_v54 = vld [vmem:[#allocation2 + $0x80] sm:$0xff] }
  0x3d   :  { %v105_v13 = vsub.s32 0, %v103_v10  ;;  %v132_v4 = vadd.s32 3, %v128_v59  ;;  %v517_v59 = vld [vmem:[#allocation2 + $0x90] sm:$0xff] }
  0x3e   :  { %v205_v16 = vshrl.u32 %v204_v14, 30 }
  0x3f   :  { %v3420_v15 = vmin.u32 %v105_v13, %v103_v10  ;;  %v133_v9 = vand.u32 3, %v132_v4 }
  0x40   :  { %v206_v18 = vshll.u32 %v205_v16, 30  ;;  %v229_v63 = vsub.s32 4, %v205_v16 }
  0x41   :  { %v107_v17 = vclz %v3420_v15  ;;  %vm138_vm4 = vcmp.eq.s32.totalorder %v133_v9, 2  ;;  %vm135_vm5 = vcmp.eq.s32.totalorder %v133_v9, 0  ;;  %vm134_vm6 = vcmp.lt.s32.totalorder %v133_v9, 2  ;;  %v998_v9 = vld [vmem:[#allocation2 + $0x240] sm:$0xff] }
  0x42   :  { %v207_v20 = vsub.s32 %v203_v12, %v206_v18  ;;  %v230_v3 = vsel %vm145_vm2, %v229_v63, %v205_v16  ;;  %v595_v63 = vld [vmem:[#allocation2 + $0xc8] sm:$0xff] }
  0x43   :  { %v3421_v19 = vadd.s32 4294967294, %v107_v17  ;;  %v232_v12 = vsel %vm144_vm3, 0, %v230_v3 }
  0x44   :  { %v209_v24 = vsub.s32 0, %v207_v20  ;;  %v236_v17 = vadd.s32 3, %v232_v12  ;;  %v1000_v12 = vld [vmem:[#allocation2 + $0x250] sm:$0xff] }
  0x45   :  { %vm3422_vm13 = vcmp.lt.s32.totalorder %v3421_v19, 0 }
  0x46   :  { %v110_v34 = vsel %vm3422_vm13, 0, %v3421_v19  ;;  %v3424_v28 = vmin.u32 %v209_v24, %v207_v20  ;;  %vm360_vm13 = vcmask 261120  }
  0x47   :  { %v111_v25 = vsub.s32 32, %v110_v34  ;;  %v112_v26 = vshll.u32 %v103_v10, %v110_v34  ;;  %v115_v27 = vsub.s32 4294967266, %v110_v34 }
  0x48   :  { %v211_v31 = vclz %v3424_v28 }
  0x49   :  { %v113_v29 = vshrl.u32 %v95_v23, %v111_v25  ;;  %v116_v30 = vadd.s32 127, %v115_v27  ;;  %v35_v27 = vld [vmem:[%s5422_s2 + $0x10] sm:$0xff] }
  0x4a   :  { %v3425_v39 = vadd.s32 4294967294, %v211_v31 }
  0x4b   :  { %v114_v35 = vor.u32 %v113_v29, %v112_v26  ;;  %v117_v37 = vshll.u32 %v116_v30, 23 }
  0x4c   :  { %vm3426_vm14 = vcmp.lt.s32.totalorder %v3425_v39, 0 }
  0x4d   :  { %v118_v41 = vor.u32 4788187, %v117_v37  ;;  %v121_v43 = vcvt.s32.f32 %v114_v35  ;;  %v214_v22 = vsel %vm3426_vm14, 0, %v3425_v39  ;;  %v36_v35 = vld [vmem:[%s5422_s2 + $0x18] sm:$0xff] }
  0x4e   :  { %v215_v47 = vsub.s32 32, %v214_v22  ;;  %v216_v32 = vshll.u32 %v207_v20, %v214_v22  ;;  %v219_v48 = vsub.s32 4294967266, %v214_v22  ;;  %v237_v20 = vand.u32 3, %v236_v17  ;;  %v436_v22 = vld [vmem:[#allocation2 + $0x40] sm:$0xff]  ;;  %v1003_v17 = vld [vmem:[#allocation2 + $0x268] sm:$0xff] }
  0x4f   :  { %v119_v45 = vand.u32 2147483647, %v118_v41 }
  0x50   :  { %v217_v50 = vshrl.u32 %v199_v33, %v215_v47  ;;  %v220_v51 = vadd.s32 127, %v219_v48  ;;  %vm242_vm8 = vcmp.eq.s32.totalorder %v237_v20, 2  ;;  %vm239_vm9 = vcmp.eq.s32.totalorder %v237_v20, 0  ;;  %v437_v47 = vld [vmem:[#allocation2 + $0x48] sm:$0xff] }
  0x51   :  { %v122_v49 = vmul.f32 %v121_v43, %v119_v45  ;;  %vm238_vm10 = vcmp.lt.s32.totalorder %v237_v20, 2 }
  0x52   :  { %v218_v55 = vor.u32 %v217_v50, %v216_v32  ;;  %v221_v56 = vshll.u32 %v220_v51, 23  ;;  %v4210_v32 = vpack.c.bf16 %v437_v47, %v436_v22  ;;  %v439_v50 = vld [vmem:[#allocation2 + $0x58] sm:$0xff] }
  0x53   :  { %v123_v53 = vxor.u32 2147483648, %v122_v49 }
  0x54   :  { %v222_v60 = vor.u32 4788187, %v221_v56  ;;  %v225_v61 = vcvt.s32.f32 %v218_v55  ;;  %v516_v55 = vld [vmem:[#allocation2 + $0x88] sm:$0xff] }
  0x55   :  { %v124_v57 = vsel %vm41_vm15, %v123_v53, %v122_v49  ;;  %v438_v49 = vld [vmem:[#allocation2 + $0x50] sm:$0xff] }
  0x56   :  { %v127_v58 = vsel %vm40_vm1, %v4657_v5, %v124_v57  ;;  %v223_v62 = vand.u32 2147483647, %v222_v60  ;;  %v4213_v53 = vpack.c.bf16 %v439_v50, %v438_v49  ;;  %v518_v60 = vld [vmem:[#allocation2 + $0x98] sm:$0xff] }
  0x57   :  { %4534 = vcosq.f32 %v127_v58 }
  0x58   :  { %4536 = vsinq.f32 %v127_v58  ;;  %v226_v7 = vmul.f32 %v225_v61, %v223_v62  ;;  %v4216_v58 = vpack.c.bf16 %v516_v55, %v515_v54  ;;  %v4219_v61 = vpack.c.bf16 %v518_v60, %v517_v59  ;;  %v594_v62 = vld [vmem:[#allocation2 + $0xc0] sm:$0xff] }
  0x59   :  { %v4222_v4 = vpack.c.bf16 %v595_v63, %v594_v62 }
  0x5a   :  { %v227_v8 = vxor.u32 2147483648, %v226_v7 }
  0x5c   :  { %v228_v10 = vsel %vm145_vm2, %v227_v8, %v226_v7  ;;  %v596_v7 = vld [vmem:[#allocation2 + $0xd0] sm:$0xff]  ;;  %v597_v8 = vld [vmem:[#allocation2 + $0xd8] sm:$0xff] }
  0x5d   :  { %v231_v46 = vsel %vm144_vm3, %v4660_v6, %v228_v10  ;;  %v254_v6 = vld [vmem:[%s5421_s1 + $0x8] sm:$0xff]  ;;  %v4225_v3 = vpack.c.bf16 %v597_v8, %v596_v7 }
  0x5e   :  { %4538 = vcosq.f32 %v231_v46  ;;  %v999_v10 = vld [vmem:[#allocation2 + $0x248] sm:$0xff] }
  0x5f   :  { %4540 = vsinq.f32 %v231_v46  ;;  %v4240_v46 = vpack.c.bf16 %v999_v10, %v998_v9 }
  0x61   :  { %v4535_v13 = vpop.eup %4534 }
  0x62   :  { %v4537_v14 = vpop.eup %4536  ;;  %v139_v15 = vxor.u32 2147483648, %v4535_v13 }
  0x63   :  { %v136_v18 = vxor.u32 2147483648, %v4537_v14 }
  0x64   :  { %v140_v19 = vsel %vm138_vm4, %v139_v15, %v4537_v14  ;;  %v1002_v15 = vld [vmem:[#allocation2 + $0x260] sm:$0xff] }
  0x65   :  { %v137_v11 = vsel %vm135_vm5, %v4535_v13, %v136_v18  ;;  %v1001_v13 = vld [vmem:[#allocation2 + $0x258] sm:$0xff]  ;;  %v355_v18 = vld [vmem:[%s5422_s2 + $0x20] sm:$0xff] }
  0x66   :  { %v141_v16 = vsel %vm134_vm6, %v137_v11, %v140_v19  ;;  %v4243_v14 = vpack.c.bf16 %v1001_v13, %v1000_v12  ;;  %v4246_v19 = vpack.c.bf16 %v1003_v17, %v1002_v15 }
  0x67   :  { %v142_v23 = vsel %vm131_vm7, nan, %v141_v16  ;;  %v672_v16 = vld [vmem:[%s5422_s2 + $0x28] sm:$0xff] }
  0x68   :  { %v4539_v34 = vpop.eup %4538  ;;  %v247_v26 = vmul.f32 %v142_v23, %v142_v23 }
  0x69   :  { %v4541_v24 = vpop.eup %4540  ;;  %v243_v25 = vxor.u32 2147483648, %v4539_v34 }
  0x6a   :  { %v240_v28 = vxor.u32 2147483648, %v4541_v24  ;;  %v249_v31 = vmul.f32 %v247_v26, %v35_v27 }
  0x6b   :  { %v244_v29 = vsel %vm242_vm8, %v243_v25, %v4541_v24 }
  0x6c   :  { %v241_v5 = vsel %vm239_vm9, %v4539_v34, %v240_v28  ;;  %v251_v43 = vadd.f32 %v249_v31, %v4643_v1  ;;  %v256_v1 = vld [vmem:[%s5421_s1 + $0x18] sm:$0xff] }
  0x6d   :  { %v245_v30 = vsel %vm238_vm10, %v241_v5, %v244_v29 }
  0x6e   :  { %v246_v37 = vsel %vm235_vm11, nan, %v245_v30  ;;  %vm789_vm11 = vcmask 64512  }
  0x6f   :  { %v248_v39 = vmul.f32 %v246_v37, %v246_v37 }
  0x71   :  { %v250_v41 = vmul.f32 %v248_v39, %v36_v35 }
  0x73   :  { %v252_v33 = vadd.f32 %v250_v41, %v4648_v2  ;;  %v4601_v2 = vmov 0.0  }
  0x74   :  { %3737 = vmatprep.mubr.msk.f32.mxu1 %vm4600_vm12, %v4601_v2 }
  0x75   :  { %v4199_v45 = vpack.c.bf16 %v252_v33, %v251_v43 }
  0x77   :  { %4200 = vmatprep.subr.bf16.mxu0 %v4199_v45 }
  0x78   :  { %4202 = vmatpush3.bf16.msra.mxu0 %v4199_v45 }
  0x79   :  { %4239 = vmatprep.subr.bf16.mxu0 %v4593_v0 }
  0x7b   :  { %3724 = vmatmul.mubr.msk.f32.vlgmr.msra.gmra.mrb[0].mxu0 %vm257_vm0, %v254_v6 }
  0x7c   :  { %3726 = vmatprep.mubr.msk.f32.mxu0 %vm257_vm0, %v255_v21  ;;  %4241 = vmatpush3.bf16.msra.mxu0 %v4240_v46 }
  0x7d   :  { %4242 = vmatprep.subr.bf16.mxu0 %v4593_v0 }
  0x7f   :  { %3727 = vmatmul.mubr.msk.f32.gmra.mrb[2].mxu0 %vm257_vm0, %v256_v1 }
  0x80   :  { %3831 = vmatprep.mubr.msk.f32.mxu0 %vm4600_vm12, %v4601_v2  ;;  %4244 = vmatpush3.bf16.msra.mxu0 %v4243_v14 }
  0x81   :  { %4245 = vmatprep.subr.bf16.mxu0 %v4593_v0 }
  0x84   :  { %4247 = vmatpush3.bf16.msra.mxu0 %v4246_v19 }
  0x85   :  { %4248 = vmatprep.subr.bf16.mxu0 %v4593_v0 }
 0x14e   :  { %v3725_v48 = vpop.f32.mrb[0].mxu0 }
 0x14f   :  { %v336_v51 = vpop.f32.mrb[1].mxu0 }
 0x150   :  { %3738 = vmatmul.mubr.msk.f32.vlgmr.msra.gmra.mrb[0].mxu1 %vm360_vm13, %v336_v51 }
 0x151   :  { %4211 = vmatpush3.bf16.msra.mxu1 %v4210_v32  ;;  %3748 = vmatprep.mubr.msk.f32.mxu1 %vm4600_vm12, %v4601_v2 }
 0x152   :  { %4212 = vmatprep.subr.bf16.mxu1 %v4593_v0  ;;  %v3728_v56 = vpop.f32.mrb[2].mxu0 }
 0x153   :  { %v346_v57 = vpop.f32.mrb[3].mxu0 }
 0x155   :  { %4214 = vmatpush3.bf16.msra.mxu1 %v4213_v53 }
 0x156   :  { %4215 = vmatprep.subr.bf16.mxu1 %v4593_v0 }
 0x158   :  { %3749 = vmatmul.mubr.msk.f32.vlgmr.msra.gmra.mrb[0].mxu1 %vm360_vm13, %v3725_v48 }
 0x159   :  { %4217 = vmatpush3.bf16.msra.mxu1 %v4216_v58  ;;  %3759 = vmatprep.mubr.msk.f32.mxu1 %vm4600_vm12, %v4601_v2 }
 0x15a   :  { %4218 = vmatprep.subr.bf16.mxu1 %v4593_v0 }
 0x15d   :  { %4220 = vmatpush3.bf16.msra.mxu1 %v4219_v61 }
 0x15e   :  { %4221 = vmatprep.subr.bf16.mxu1 %v4593_v0 }
 0x160   :  { %3760 = vmatmul.mubr.msk.f32.vlgmr.msra.gmra.mrb[0].mxu1 %vm360_vm13, %v346_v57 }
 0x161   :  { %4223 = vmatpush3.bf16.msra.mxu1 %v4222_v4  ;;  %3770 = vmatprep.mubr.msk.f32.mxu1 %vm4600_vm12, %v4601_v2 }
 0x162   :  { %4224 = vmatprep.subr.bf16.mxu1 %v4593_v0 }
 0x165   :  { %4226 = vmatpush3.bf16.msra.mxu1 %v4225_v3 }
 0x166   :  { %3773 = vmatprep.subr.mxu1 %v4601_v2 }
 0x168   :  { %3771 = vmatmul.mubr.msk.f32.vlgmr.msra.gmra.mrb[0].mxu1 %vm360_vm13, %v3728_v56  ;;  %vm922_vm13 = vcmask 523264  }
 0x169   :  { %3775 = vmatprep.mubr.msk.f32.mxu1 %vm4600_vm12, %v4601_v2 }
 0x23b   :  { %v667_v11 = vpop.f32.mrb[0].mxu1 }
 0x23c   :  { %v4807_v20 = vadd.f32 %v667_v11, %v355_v18  ;;  %v3772_v23 = vpop.f32.mrb[1].mxu1 }
 0x23e   :  { %v4810_v34 = vmul.f32 %v4807_v20, %v672_v16 }
 0x240   :  { %v678_v24 = vand.u32 2139095040, %v4810_v34  ;;  %v675_v28 = vand.u32 2147483647, %v4810_v34  ;;  %vm677_vm5 = vcmp.lt.s32.totalorder %v4810_v34, 0  ;;  %vm767_vm10 = vweird.f32 %v4810_v34 }
 0x242   :  { %v679_v25 = vshrl.u32 %v678_v24, 23  ;;  %v682_v30 = vand.u32 8388607, %v675_v28  ;;  %vm676_vm6 = vcmp.le.f32.partialorder %v675_v28, 0.7853982 }
 0x244   :  { %v3435_v26 = vadd.s32 4294967169, %v679_v25  ;;  %v683_v47 = vor.u32 8388608, %v682_v30 }
 0x246   :  { %v685_v27 = vadd.s32 1, %v3435_v26  ;;  %v723_v61 = vshll.u32 %v683_v47, 8 }
 0x248   :  { %vm686_vm0 = vcmp.gt.s32.totalorder %v685_v27, 0 }
 0x249   :  { %v687_v29 = vsel %vm686_vm0, %v685_v27, 0 }
 0x24a   :  { %v689_v5 = vand.u32 31, %v687_v29  ;;  %v688_v35 = vshrl.u32 %v687_v29, 5 }
 0x24c   :  { %v690_v31 = vsub.s32 32, %v689_v5  ;;  %v692_v37 = vshll.u32 %v4594_v36, %v689_v5  ;;  %v695_v39 = vshll.u32 %v4595_v38, %v689_v5  ;;  %v698_v33 = vshll.u32 %v4596_v40, %v689_v5 }
 0x24d   :  { %v701_v6 = vshll.u32 %v4597_v42, %v689_v5  ;;  %v704_v1 = vshll.u32 %v4598_v44, %v689_v5  ;;  %vm707_vm14 = vcmp.lt.s32.totalorder %v688_v35, 1  ;;  %vm710_vm15 = vcmp.lt.s32.totalorder %v688_v35, 4 }
 0x24e   :  { %v693_v41 = vshrl.u32 %v4595_v38, %v690_v31  ;;  %v696_v43 = vshrl.u32 %v4596_v40, %v690_v31  ;;  %v699_v45 = vshrl.u32 %v4597_v42, %v690_v31  ;;  %v702_v21 = vshrl.u32 %v4598_v44, %v690_v31 }
 0x24f   :  { %v705_v22 = vshrl.u32 %v4599_v52, %v690_v31  ;;  %v691_v56 = vshrl.u32 %v4594_v36, %v690_v31  ;;  %vm709_vm1 = vcmp.lt.s32.totalorder %v688_v35, 3  ;;  %vm708_vm2 = vcmp.lt.s32.totalorder %v688_v35, 2 }
 0x250   :  { %v694_v32 = vor.u32 %v693_v41, %v692_v37  ;;  %v697_v48 = vor.u32 %v696_v43, %v695_v39  ;;  %v700_v49 = vor.u32 %v699_v45, %v698_v33  ;;  %v703_v50 = vor.u32 %v702_v21, %v701_v6 }
 0x251   :  { %v706_v51 = vor.u32 %v705_v22, %v704_v1 }
 0x252   :  { %v712_v53 = vsel %vm710_vm15, %v700_v49, 2102212464  ;;  %v715_v54 = vsel %vm707_vm14, %v694_v32, %v697_v48  ;;  %v719_v55 = vsel %vm707_vm14, %v697_v48, %v700_v49  ;;  %v716_v57 = vsel %vm710_vm15, %v703_v50, 920167782 }
 0x253   :  { %v720_v58 = vsel %vm710_vm15, %v706_v51, 1326507024  ;;  %v717_v59 = vsel %vm709_vm1, %v700_v49, %v716_v57  ;;  %v711_v62 = vsel %vm707_vm14, %v691_v56, %v694_v32  ;;  %v713_v63 = vsel %vm709_vm1, %v697_v48, %v712_v53  ;;  %v673_v57 = vld [vmem:[%s5422_s2 + $0x30] sm:$0xff] }
 0x254   :  { %v721_v60 = vsel %vm709_vm1, %v703_v50, %v720_v58  ;;  %v718_v4 = vsel %vm708_vm2, %v715_v54, %v717_v59  ;;  %v714_v46 = vsel %vm708_vm2, %v711_v62, %v713_v63 }
 0x255   :  { %v722_v7 = vsel %vm708_vm2, %v719_v55, %v721_v60  ;;  %v4831_v9 = vmul.u32.u64.low %v723_v61, %v718_v4  ;;  %v4832_v10 = vmul.u32.u64.high %v723_v61, %v718_v4, %v4831_v9  ;;  %v730_v13 = vmul.u32 %v723_v61, %v714_v46  ;;  %v914_v60 = vld [vmem:[#allocation2 + $0x200] sm:$0xff]  ;;  %v919_v46 = vld [vmem:[#allocation2 + $0x228] sm:$0xff] }
 0x256   :  { %v4828_v8 = vmul.u32.u64.low %v723_v61, %v722_v7  ;;  %v4829_v3 = vmul.u32.u64.high %v723_v61, %v722_v7, %v4828_v8  ;;  %v915_v61 = vld [vmem:[#allocation2 + $0x208] sm:$0xff]  ;;  %v782_v4 = vld [vmem:[%s5421_s1 + $0x20] sm:$0xff] }
 0x257   :  { %v733_v12 = vadd.s32 1, %v4832_v10  ;;  %v4850_v7 = vpack.c.bf16 %v915_v61, %v914_v60  ;;  %v917_v8 = vld [vmem:[#allocation2 + $0x218] sm:$0xff] }
 0x258   :  { %vm732_vm3 = vc.u32 %v4829_v3, %v4831_v9  ;;  %v731_v27 = vadd.s32 %v4831_v9, %v4829_v3  ;;  %v783_v3 = vld [vmem:[%s5421_s1 + $0x28] sm:$0xff] }
 0x259   :  { %v734_v14 = vsel %vm732_vm3, %v733_v12, %v4832_v10  ;;  %v918_v10 = vld [vmem:[#allocation2 + $0x220] sm:$0xff]  ;;  %v784_v12 = vld [vmem:[%s5421_s1 + $0x30] sm:$0xff] }
 0x25a   :  { %v735_v15 = vadd.s32 %v734_v14, %v730_v13  ;;  %v4870_v13 = vpack.c.bf16 %v919_v46, %v918_v10  ;;  %v920_v14 = vld [vmem:[#allocation2 + $0x230] sm:$0xff]  ;;  %v1250_v46 = vld [vmem:[#allocation2 + $0x318] sm:$0xff] }
 0x25b   :  { %v1249_v10 = vld [vmem:[#allocation2 + $0x310] sm:$0xff] }
 0x25c   :  { %v736_v17 = vadd.s32 536870912, %v735_v15 }
 0x25e   :  { %v737_v18 = vshrl.u32 %v736_v17, 30  ;;  %v785_v17 = vld [vmem:[%s5421_s1 + $0x38] sm:$0xff] }
 0x260   :  { %v738_v19 = vshll.u32 %v737_v18, 30  ;;  %v761_v6 = vsub.s32 4, %v737_v18 }
 0x262   :  { %v739_v11 = vsub.s32 %v735_v15, %v738_v19  ;;  %v762_v22 = vsel %vm677_vm5, %v761_v6, %v737_v18  ;;  %v921_v15 = vld [vmem:[#allocation2 + $0x238] sm:$0xff]  ;;  %v786_v19 = vld [vmem:[%s5421_s1 + $0x40] sm:$0xff] }
 0x263   :  { %v764_v32 = vsel %vm676_vm6, 0, %v762_v22  ;;  %v4880_v18 = vpack.c.bf16 %v921_v15, %v920_v14  ;;  %v1088_v22 = vld [vmem:[#allocation2 + $0x2b8] sm:$0xff]  ;;  %v1251_v14 = vld [vmem:[#allocation2 + $0x320] sm:$0xff]  ;;  %v1252_v15 = vld [vmem:[#allocation2 + $0x328] sm:$0xff] }
 0x264   :  { %v741_v16 = vsub.s32 0, %v739_v11  ;;  %v768_v48 = vadd.s32 3, %v764_v32  ;;  %v1164_v32 = vld [vmem:[#allocation2 + $0x2c0] sm:$0xff] }
 0x266   :  { %v3436_v23 = vmin.u32 %v741_v16, %v739_v11  ;;  %v769_v49 = vand.u32 3, %v768_v48  ;;  %v788_v16 = vld [vmem:[%s5421_s1 + $0x50] sm:$0xff]  ;;  %v1165_v48 = vld [vmem:[#allocation2 + $0x2c8] sm:$0xff] }
 0x268   :  { %v743_v24 = vclz %v3436_v23  ;;  %vm774_vm7 = vcmp.eq.s32.totalorder %v769_v49, 2  ;;  %vm771_vm8 = vcmp.eq.s32.totalorder %v769_v49, 0  ;;  %vm770_vm9 = vcmp.lt.s32.totalorder %v769_v49, 2  ;;  %v1004_v23 = vld [vmem:[#allocation2 + $0x270] sm:$0xff] }
 0x26a   :  { %v3437_v25 = vadd.s32 4294967294, %v743_v24  ;;  %v1005_v24 = vld [vmem:[#allocation2 + $0x278] sm:$0xff] }
 0x26c   :  { %vm3438_vm4 = vcmp.lt.s32.totalorder %v3437_v25, 0 }
 0x26d   :  { %v746_v26 = vsel %vm3438_vm4, 0, %v3437_v25  ;;  %v4249_v25 = vpack.c.bf16 %v1005_v24, %v1004_v23  ;;  %v1330_v23 = vld [vmem:[#allocation2 + $0x340] sm:$0xff]  ;;  %v1331_v24 = vld [vmem:[#allocation2 + $0x348] sm:$0xff] }
 0x26e   :  { %v747_v29 = vsub.s32 32, %v746_v26  ;;  %v751_v5 = vsub.s32 4294967266, %v746_v26  ;;  %v748_v30 = vshll.u32 %v739_v11, %v746_v26  ;;  %v787_v11 = vld [vmem:[%s5421_s1 + $0x48] sm:$0xff]  ;;  %v1081_v26 = vld [vmem:[#allocation2 + $0x280] sm:$0xff] }
 0x26f   :  { %4250 = vmatpush3.bf16.msra.mxu0 %v4249_v25  ;;  %v4930_v25 = vpack.c.bf16 %v1331_v24, %v1330_v23 }
 0x270   :  { %v749_v31 = vshrl.u32 %v731_v27, %v747_v29  ;;  %v752_v35 = vadd.s32 127, %v751_v5  ;;  %4251 = vmatprep.subr.bf16.mxu0 %v4593_v0  ;;  %v1082_v27 = vld [vmem:[#allocation2 + $0x288] sm:$0xff] }
 0x272   :  { %v750_v37 = vor.u32 %v749_v31, %v748_v30  ;;  %v753_v39 = vshll.u32 %v752_v35, 23  ;;  %v4252_v30 = vpack.c.bf16 %v1082_v27, %v1081_v26  ;;  %v1083_v31 = vld [vmem:[#allocation2 + $0x290] sm:$0xff]  ;;  %v1084_v35 = vld [vmem:[#allocation2 + $0x298] sm:$0xff] }
 0x273   :  { %v1332_v26 = vld [vmem:[#allocation2 + $0x350] sm:$0xff]  ;;  %v1333_v27 = vld [vmem:[#allocation2 + $0x358] sm:$0xff] }
 0x274   :  { %v754_v41 = vor.u32 4788187, %v753_v39  ;;  %v757_v33 = vcvt.s32.f32 %v750_v37 }
 0x276   :  { %v755_v43 = vand.u32 2147483647, %v754_v41  ;;  %v4255_v41 = vpack.c.bf16 %v1084_v35, %v1083_v31  ;;  %v1336_v35 = vld [vmem:[#allocation2 + $0x370] sm:$0xff] }
 0x278   :  { %v758_v45 = vmul.f32 %v757_v33, %v755_v43  ;;  %v1085_v43 = vld [vmem:[#allocation2 + $0x2a0] sm:$0xff]  ;;  %v1086_v33 = vld [vmem:[#allocation2 + $0x2a8] sm:$0xff] }
 0x27a   :  { %v759_v21 = vxor.u32 2147483648, %v758_v45 }
 0x27c   :  { %v760_v1 = vsel %vm677_vm5, %v759_v21, %v758_v45  ;;  %v4258_v21 = vpack.c.bf16 %v1086_v33, %v1085_v43  ;;  %v911_v33 = vld [vmem:[%s5422_s2 + $0x38] sm:$0xff] }
 0x27d   :  { %v763_v47 = vsel %vm676_vm6, %v4810_v34, %v760_v1  ;;  %v916_v34 = vld [vmem:[#allocation2 + $0x210] sm:$0xff] }
 0x27e   :  { %4542 = vcosq.f32 %v763_v47  ;;  %v4860_v9 = vpack.c.bf16 %v917_v8, %v916_v34  ;;  %v1087_v1 = vld [vmem:[#allocation2 + $0x2b0] sm:$0xff]  ;;  %v1247_v34 = vld [vmem:[#allocation2 + $0x300] sm:$0xff]  ;;  %v1248_v8 = vld [vmem:[#allocation2 + $0x308] sm:$0xff] }
 0x27f   :  { %4544 = vsinq.f32 %v763_v47  ;;  %v4261_v47 = vpack.c.bf16 %v1088_v22, %v1087_v1 }
 0x288   :  { %v4543_v50 = vpop.eup %4542 }
 0x289   :  { %v4545_v51 = vpop.eup %4544  ;;  %v775_v53 = vxor.u32 2147483648, %v4543_v50 }
 0x28a   :  { %v772_v54 = vxor.u32 2147483648, %v4545_v51 }
 0x28b   :  { %v776_v55 = vsel %vm774_vm7, %v775_v53, %v4545_v51  ;;  %v4264_v51 = vpack.c.bf16 %v1165_v48, %v1164_v32  ;;  %v1166_v53 = vld [vmem:[#allocation2 + $0x2d0] sm:$0xff] }
 0x28c   :  { %v773_v56 = vsel %vm771_vm8, %v4543_v50, %v772_v54  ;;  %v1167_v54 = vld [vmem:[#allocation2 + $0x2d8] sm:$0xff] }
 0x28d   :  { %v777_v28 = vsel %vm770_vm9, %v773_v56, %v776_v55 }
 0x28e   :  { %v778_v58 = vsel %vm767_vm10, nan, %v777_v28  ;;  %v4267_v28 = vpack.c.bf16 %v1167_v54, %v1166_v53 }
 0x28f   :  { %v779_v59 = vmul.f32 %v778_v58, %v778_v58  ;;  %v1169_v58 = vld [vmem:[#allocation2 + $0x2e8] sm:$0xff] }
 0x291   :  { %v780_v62 = vmul.f32 %v779_v59, %v673_v57  ;;  %v1168_v57 = vld [vmem:[#allocation2 + $0x2e0] sm:$0xff] }
 0x292   :  { %v4270_v61 = vpack.c.bf16 %v1169_v58, %v1168_v57 }
 0x293   :  { %v781_v63 = vadd.f32 %v4807_v20, %v780_v62  ;;  %v1170_v62 = vld [vmem:[#allocation2 + $0x2f0] sm:$0xff] }
 0x295   :  { %3774 = vmatpush3.msra.mxu1 %v781_v63  ;;  %v1171_v63 = vld [vmem:[#allocation2 + $0x2f8] sm:$0xff] }
 0x296   :  { %3776 = vmatmul.mubr.msk.f32.vlgmr.msra.gmra.mrb[2].mxu1 %vm789_vm11, %v782_v4  ;;  %4227 = vmatprep.subr.bf16.mxu1 %v4593_v0  ;;  %v4273_v4 = vpack.c.bf16 %v1171_v63, %v1170_v62 }
 0x297   :  { %3778 = vmatprep.mubr.msk.f32.mxu1 %vm4600_vm12, %v4601_v2  ;;  %4229 = vmatpush3.bf16.msra.mxu1 %v4850_v7 }
 0x298   :  { %4230 = vmatprep.subr.bf16.mxu1 %v4593_v0 }
 0x29a   :  { %3779 = vmatmul.mubr.msk.f32.gmra.mrb[4].mxu1 %vm789_vm11, %v783_v3  ;;  %v4276_v3 = vpack.c.bf16 %v1248_v8, %v1247_v34 }
 0x29b   :  { %3781 = vmatprep.mubr.msk.f32.mxu1 %vm4600_vm12, %v4601_v2  ;;  %4232 = vmatpush3.bf16.msra.mxu1 %v4860_v9 }
 0x29c   :  { %4233 = vmatprep.subr.bf16.mxu1 %v4593_v0 }
 0x29e   :  { %3782 = vmatmul.mubr.msk.f32.gmra.mrb[6].mxu1 %vm789_vm11, %v784_v12  ;;  %v4279_v12 = vpack.c.bf16 %v1250_v46, %v1249_v10 }
 0x29f   :  { %3784 = vmatprep.mubr.msk.f32.mxu1 %vm4600_vm12, %v4601_v2  ;;  %4235 = vmatpush3.bf16.msra.mxu1 %v4870_v13 }
 0x2a0   :  { %4236 = vmatprep.subr.bf16.mxu1 %v4593_v0 }
 0x2a2   :  { %3785 = vmatmul.mubr.msk.f32.gmra.mrb[8].mxu1 %vm789_vm11, %v785_v17  ;;  %v4282_v17 = vpack.c.bf16 %v1252_v15, %v1251_v14 }
 0x2a3   :  { %3787 = vmatprep.mubr.msk.f32.mxu1 %vm4600_vm12, %v4601_v2  ;;  %4238 = vmatpush3.bf16.msra.mxu1 %v4880_v18 }
 0x2a4   :  { %3910 = vmatprep.subr.mxu1 %v4601_v2 }
 0x2a6   :  { %3788 = vmatmul.mubr.msk.f32.gmra.mrb[10].mxu1 %vm789_vm11, %v786_v19  ;;  %v1253_v19 = vld [vmem:[#allocation2 + $0x330] sm:$0xff] }
 0x2a7   :  { %3790 = vmatprep.mubr.msk.f32.mxu1 %vm4600_vm12, %v4601_v2 }
 0x2aa   :  { %3791 = vmatmul.mubr.msk.f32.gmra.mrb[12].mxu1 %vm789_vm11, %v787_v11  ;;  %v1254_v11 = vld [vmem:[#allocation2 + $0x338] sm:$0xff] }
 0x2ab   :  { %3793 = vmatprep.mubr.msk.f32.mxu1 %vm4600_vm12, %v4601_v2 }
 0x2ae   :  { %3794 = vmatmul.mubr.msk.f32.gmra.mrb[14].mxu1 %vm789_vm11, %v788_v16  ;;  %v4285_v16 = vpack.c.bf16 %v1254_v11, %v1253_v19 }
 0x2af   :  { %3812 = vmatprep.mubr.msk.f32.mxu1 %vm4600_vm12, %v4601_v2 }
 0x369   :  { %v877_v29 = vpop.f32.mrb[2].mxu1 }
 0x36a   :  { %v3777_v5 = vpop.f32.mrb[3].mxu1  ;;  %3813 = vmatmul.mubr.msk.f32.vlgmr.msra.gmra.mrb[8].mxu1 %vm922_vm13, %v877_v29  ;;  %v4935_v29 = vpack.c.bf16 %v1333_v27, %v1332_v26 }
 0x36b   :  { %3912 = vmatprep.mubr.msk.f32.mxu1 %vm4600_vm12, %v4601_v2  ;;  %v1334_v5 = vld [vmem:[#allocation2 + $0x360] sm:$0xff] }
 0x36d   :  { %v882_v37 = vpop.f32.mrb[4].mxu1 }
 0x36e   :  { %v3780_v39 = vpop.f32.mrb[5].mxu1  ;;  %3832 = vmatmul.mubr.msk.f32.vlgmr.msra.gmra.mrb[4].mxu0 %vm922_vm13, %v882_v37  ;;  %v1337_v37 = vld [vmem:[#allocation2 + $0x378] sm:$0xff] }
 0x36f   :  { %4253 = vmatpush3.bf16.msra.mxu0 %v4252_v30  ;;  %3850 = vmatprep.mubr.msk.f32.mxu0 %vm4600_vm12, %v4601_v2  ;;  %v1335_v30 = vld [vmem:[#allocation2 + $0x368] sm:$0xff]  ;;  %v4945_v39 = vpack.c.bf16 %v1337_v37, %v1336_v35 }
 0x370   :  { %4254 = vmatprep.subr.bf16.mxu0 %v4593_v0  ;;  %v4941_v31 = vpack.c.bf16 %v1335_v30, %v1334_v5 }
 0x371   :  { %v887_v45 = vpop.f32.mrb[6].mxu1 }
 0x372   :  { %v3783_v6 = vpop.f32.mrb[7].mxu1 }
 0x373   :  { %4256 = vmatpush3.bf16.msra.mxu0 %v4255_v41 }
 0x374   :  { %4257 = vmatprep.subr.bf16.mxu0 %v4593_v0 }
 0x377   :  { %4259 = vmatpush3.bf16.msra.mxu0 %v4258_v21  ;;  %v1412_v21 = vld [vmem:[%s5422_s2 + $0x40] sm:$0xff] }
 0x378   :  { %4260 = vmatprep.subr.bf16.mxu0 %v4593_v0 }
 0x379   :  { %v897_v49 = vpop.f32.mrb[10].mxu1 }
 0x37a   :  { %v3789_v50 = vpop.f32.mrb[11].mxu1 }
 0x37b   :  { %4262 = vmatpush3.bf16.msra.mxu0 %v4261_v47 }
 0x37c   :  { %4263 = vmatprep.subr.bf16.mxu0 %v4593_v0 }
 0x37d   :  { %v902_v55 = vpop.f32.mrb[12].mxu1 }
 0x37e   :  { %3851 = vmatmul.mubr.msk.f32.vlgmr.msra.gmra.mrb[4].mxu0 %vm922_vm13, %v887_v45  ;;  %v3792_v56 = vpop.f32.mrb[13].mxu1 }
 0x37f   :  { %4265 = vmatpush3.bf16.msra.mxu0 %v4264_v51  ;;  %3869 = vmatprep.mubr.msk.f32.mxu0 %vm4600_vm12, %v4601_v2 }
 0x380   :  { %4266 = vmatprep.subr.bf16.mxu0 %v4593_v0 }
 0x381   :  { %v907_v59 = vpop.f32.mrb[14].mxu1 }
 0x382   :  { %v3795_v60 = vpop.f32.mrb[15].mxu1 }
 0x383   :  { %4268 = vmatpush3.bf16.msra.mxu0 %v4267_v28 }
 0x384   :  { %4269 = vmatprep.subr.bf16.mxu0 %v4593_v0 }
 0x387   :  { %4271 = vmatpush3.bf16.msra.mxu0 %v4270_v61 }
 0x388   :  { %4272 = vmatprep.subr.bf16.mxu0 %v4593_v0 }
 0x38b   :  { %4274 = vmatpush3.bf16.msra.mxu0 %v4273_v4 }
 0x38c   :  { %4275 = vmatprep.subr.bf16.mxu0 %v4593_v0 }
 0x38e   :  { %3870 = vmatmul.mubr.msk.f32.vlgmr.msra.gmra.mrb[4].mxu0 %vm922_vm13, %v897_v49 }
 0x38f   :  { %4277 = vmatpush3.bf16.msra.mxu0 %v4276_v3  ;;  %3888 = vmatprep.mubr.msk.f32.mxu0 %vm4600_vm12, %v4601_v2 }
 0x390   :  { %4278 = vmatprep.subr.bf16.mxu0 %v4593_v0 }
 0x393   :  { %4280 = vmatpush3.bf16.msra.mxu0 %v4279_v12 }
 0x394   :  { %4281 = vmatprep.subr.bf16.mxu0 %v4593_v0 }
 0x397   :  { %4283 = vmatpush3.bf16.msra.mxu0 %v4282_v17 }
 0x398   :  { %4284 = vmatprep.subr.bf16.mxu0 %v4593_v0 }
 0x39b   :  { %4286 = vmatpush3.bf16.msra.mxu0 %v4285_v16 }
 0x39c   :  { %4287 = vmatprep.subr.bf16.mxu0 %v4593_v0 }
 0x39e   :  { %3889 = vmatmul.mubr.msk.f32.vlgmr.msra.gmra.mrb[4].mxu0 %vm922_vm13, %v902_v55 }
 0x39f   :  { %4289 = vmatpush3.bf16.msra.mxu0 %v4930_v25  ;;  %3907 = vmatprep.mubr.msk.f32.mxu0 %vm4600_vm12, %v4601_v2 }
 0x3a0   :  { %4290 = vmatprep.subr.bf16.mxu0 %v4593_v0 }
 0x3a3   :  { %4292 = vmatpush3.bf16.msra.mxu0 %v4935_v29 }
 0x3a4   :  { %4293 = vmatprep.subr.bf16.mxu0 %v4593_v0 }
 0x3a7   :  { %4295 = vmatpush3.bf16.msra.mxu0 %v4941_v31 }
 0x3a8   :  { %4296 = vmatprep.subr.bf16.mxu0 %v4593_v0 }
 0x3ab   :  { %4298 = vmatpush3.bf16.msra.mxu0 %v4945_v39 }
 0x3ac   :  { %4052 = vmatprep.subr.mxu0 %v4601_v2 }
 0x3ae   :  { %3908 = vmatmul.mubr.msk.f32.vlgmr.msra.gmra.mrb[4].mxu0 %vm922_vm13, %v907_v59 }
 0x3af   :  { %4054 = vmatprep.mubr.msk.f32.mxu0 %vm4600_vm12, %v4601_v2 }
 0x43d   :  { %v992_v41 = vpop.f32.mrb[8].mxu1 }
 0x43e   :  { %v3814_v43 = vpop.f32.mrb[9].mxu1  ;;  %v4446_v45 = vadd.f32 %v992_v41, %v911_v33 }
 0x481   :  { %v1407_v6 = vpop.f32.mrb[4].mxu0 }
 0x482   :  { %v4959_v1 = vadd.f32 %v4446_v45, %v1407_v6  ;;  %v3909_v22 = vpop.f32.mrb[5].mxu0 }
 0x484   :  { %v4962_v47 = vmul.f32 %v4959_v1, %v1412_v21 }
 0x486   :  { %v1418_v32 = vand.u32 2139095040, %v4962_v47  ;;  %v1415_v51 = vand.u32 2147483647, %v4962_v47  ;;  %vm1417_vm5 = vcmp.lt.s32.totalorder %v4962_v47, 0  ;;  %vm1507_vm10 = vweird.f32 %v4962_v47 }
 0x488   :  { %v1419_v48 = vshrl.u32 %v1418_v32, 23  ;;  %v1422_v55 = vand.u32 8388607, %v1415_v51  ;;  %vm1416_vm6 = vcmp.le.f32.partialorder %v1415_v51, 0.7853982 }
 0x48a   :  { %v3452_v49 = vadd.s32 4294967169, %v1419_v48  ;;  %v1423_v3 = vor.u32 8388608, %v1422_v55 }
 0x48c   :  { %v1425_v50 = vadd.s32 1, %v3452_v49  ;;  %v1463_v5 = vshll.u32 %v1423_v3, 8 }
 0x48e   :  { %vm1426_vm0 = vcmp.gt.s32.totalorder %v1425_v50, 0 }
 0x48f   :  { %v1427_v53 = vsel %vm1426_vm0, %v1425_v50, 0 }
 0x490   :  { %v1429_v54 = vand.u32 31, %v1427_v53  ;;  %v1428_v28 = vshrl.u32 %v1427_v53, 5 }
 0x492   :  { %v1430_v56 = vsub.s32 32, %v1429_v54  ;;  %v1432_v57 = vshll.u32 %v4594_v36, %v1429_v54  ;;  %v1435_v58 = vshll.u32 %v4595_v38, %v1429_v54  ;;  %v1438_v61 = vshll.u32 %v4596_v40, %v1429_v54 }
 0x493   :  { %v1441_v63 = vshll.u32 %v4597_v42, %v1429_v54  ;;  %v1444_v34 = vshll.u32 %v4598_v44, %v1429_v54  ;;  %vm1447_vm14 = vcmp.lt.s32.totalorder %v1428_v28, 1  ;;  %vm1450_vm15 = vcmp.lt.s32.totalorder %v1428_v28, 4 }
 0x494   :  { %v1433_v59 = vshrl.u32 %v4595_v38, %v1430_v56  ;;  %v1436_v60 = vshrl.u32 %v4596_v40, %v1430_v56  ;;  %v1439_v62 = vshrl.u32 %v4597_v42, %v1430_v56  ;;  %v1442_v4 = vshrl.u32 %v4598_v44, %v1430_v56 }
 0x495   :  { %v1445_v8 = vshrl.u32 %v4599_v52, %v1430_v56  ;;  %v1431_v16 = vshrl.u32 %v4594_v36, %v1430_v56  ;;  %vm1449_vm1 = vcmp.lt.s32.totalorder %v1428_v28, 3  ;;  %vm1448_vm2 = vcmp.lt.s32.totalorder %v1428_v28, 2 }
 0x496   :  { %v1434_v10 = vor.u32 %v1433_v59, %v1432_v57  ;;  %v1437_v46 = vor.u32 %v1436_v60, %v1435_v58  ;;  %v1440_v12 = vor.u32 %v1439_v62, %v1438_v61  ;;  %v1443_v14 = vor.u32 %v1442_v4, %v1441_v63 }
 0x497   :  { %v1446_v15 = vor.u32 %v1445_v8, %v1444_v34 }
 0x498   :  { %v1452_v17 = vsel %vm1450_vm15, %v1440_v12, 2102212464  ;;  %v1455_v19 = vsel %vm1447_vm14, %v1434_v10, %v1437_v46  ;;  %v1459_v11 = vsel %vm1447_vm14, %v1437_v46, %v1440_v12  ;;  %v1456_v23 = vsel %vm1450_vm15, %v1443_v14, 920167782 }
 0x499   :  { %v1460_v24 = vsel %vm1450_vm15, %v1446_v15, 1326507024  ;;  %v1457_v26 = vsel %vm1449_vm1, %v1440_v12, %v1456_v23  ;;  %v1451_v30 = vsel %vm1447_vm14, %v1431_v16, %v1434_v10  ;;  %v1453_v35 = vsel %vm1449_vm1, %v1437_v46, %v1452_v17 }
 0x49a   :  { %v1461_v27 = vsel %vm1449_vm1, %v1443_v14, %v1460_v24  ;;  %v1458_v37 = vsel %vm1448_vm2, %v1455_v19, %v1457_v26  ;;  %v1454_v21 = vsel %vm1448_vm2, %v1451_v30, %v1453_v35 }
 0x49b   :  { %v1462_v41 = vsel %vm1448_vm2, %v1459_v11, %v1461_v27  ;;  %v4982_v45 = vmul.u32.u64.low %v1463_v5, %v1458_v37  ;;  %v4983_v6 = vmul.u32.u64.high %v1463_v5, %v1458_v37, %v4982_v45  ;;  %v1470_v32 = vmul.u32 %v1463_v5, %v1454_v21 }
 0x49c   :  { %v4979_v43 = vmul.u32.u64.low %v1463_v5, %v1462_v41  ;;  %v4980_v33 = vmul.u32.u64.high %v1463_v5, %v1462_v41, %v4979_v43 }
 0x49d   :  { %v1473_v22 = vadd.s32 1, %v4983_v6  ;;  %v1413_v43 = vld [vmem:[%s5422_s2 + $0x48] sm:$0xff] }
 0x49e   :  { %vm1472_vm3 = vc.u32 %v4980_v33, %v4982_v45  ;;  %v1471_v60 = vadd.s32 %v4982_v45, %v4980_v33 }
 0x49f   :  { %v1474_v48 = vsel %vm1472_vm3, %v1473_v22, %v4983_v6  ;;  %v1522_v22 = vld [vmem:[%s5421_s1 + $0xc8] sm:$0xff] }
 0x4a0   :  { %v1475_v49 = vadd.s32 %v1474_v48, %v1470_v32  ;;  %v1597_v32 = vld [vmem:[%s5422_s2 + $0x50] sm:$0xff] }
 0x4a2   :  { %v1476_v50 = vadd.s32 536870912, %v1475_v49 }
 0x4a4   :  { %v1477_v53 = vshrl.u32 %v1476_v50, 30 }
 0x4a6   :  { %v1478_v54 = vshll.u32 %v1477_v53, 30  ;;  %v1501_v15 = vsub.s32 4, %v1477_v53 }
 0x4a8   :  { %v1479_v55 = vsub.s32 %v1475_v49, %v1478_v54  ;;  %v1502_v11 = vsel %vm1417_vm5, %v1501_v15, %v1477_v53  ;;  %v1599_v49 = vld [vmem:[%s5422_s2 + $0x58] sm:$0xff] }
 0x4a9   :  { %v1504_v23 = vsel %vm1416_vm6, 0, %v1502_v11 }
 0x4aa   :  { %v1481_v56 = vsub.s32 0, %v1479_v55  ;;  %v1508_v24 = vadd.s32 3, %v1504_v23 }
 0x4ac   :  { %v3453_v28 = vmin.u32 %v1481_v56, %v1479_v55  ;;  %v1509_v26 = vand.u32 3, %v1508_v24 }
 0x4ae   :  { %v1483_v57 = vclz %v3453_v28  ;;  %vm1514_vm7 = vcmp.eq.s32.totalorder %v1509_v26, 2  ;;  %vm1511_vm8 = vcmp.eq.s32.totalorder %v1509_v26, 0  ;;  %vm1510_vm9 = vcmp.lt.s32.totalorder %v1509_v26, 2 }
 0x4b0   :  { %v3454_v58 = vadd.s32 4294967294, %v1483_v57 }
 0x4b2   :  { %vm3455_vm4 = vcmp.lt.s32.totalorder %v3454_v58, 0 }
 0x4b3   :  { %v1486_v59 = vsel %vm3455_vm4, 0, %v3454_v58 }
 0x4b4   :  { %v1487_v61 = vsub.s32 32, %v1486_v59  ;;  %v1491_v62 = vsub.s32 4294967266, %v1486_v59  ;;  %v1488_v63 = vshll.u32 %v1479_v55, %v1486_v59 }
 0x4b6   :  { %v1489_v4 = vshrl.u32 %v1471_v60, %v1487_v61  ;;  %v1492_v34 = vadd.s32 127, %v1491_v62 }
 0x4b8   :  { %v1490_v8 = vor.u32 %v1489_v4, %v1488_v63  ;;  %v1493_v3 = vshll.u32 %v1492_v34, 23 }
 0x4ba   :  { %v1494_v10 = vor.u32 4788187, %v1493_v3  ;;  %v1497_v12 = vcvt.s32.f32 %v1490_v8 }
 0x4bc   :  { %v1495_v46 = vand.u32 2147483647, %v1494_v10 }
 0x4be   :  { %v1498_v14 = vmul.f32 %v1497_v12, %v1495_v46 }
 0x4c0   :  { %v1499_v17 = vxor.u32 2147483648, %v1498_v14 }
 0x4c2   :  { %v1500_v19 = vsel %vm1417_vm5, %v1499_v17, %v1498_v14 }
 0x4c3   :  { %v1503_v16 = vsel %vm1416_vm6, %v4962_v47, %v1500_v19 }
 0x4c4   :  { %4546 = vcosq.f32 %v1503_v16 }
 0x4c5   :  { %4548 = vsinq.f32 %v1503_v16 }
 0x4ce   :  { %v4547_v27 = vpop.eup %4546 }
 0x4cf   :  { %v4549_v5 = vpop.eup %4548  ;;  %v1515_v30 = vxor.u32 2147483648, %v4547_v27 }
 0x4d0   :  { %v1512_v35 = vxor.u32 2147483648, %v4549_v5 }
 0x4d1   :  { %v1516_v37 = vsel %vm1514_vm7, %v1515_v30, %v4549_v5 }
 0x4d2   :  { %v1513_v41 = vsel %vm1511_vm8, %v4547_v27, %v1512_v35 }
 0x4d3   :  { %v1517_v51 = vsel %vm1510_vm9, %v1513_v41, %v1516_v37 }
 0x4d4   :  { %v1518_v33 = vsel %vm1507_vm10, nan, %v1517_v51 }
 0x4d5   :  { %v1519_v45 = vmul.f32 %v1518_v33, %v1518_v33 }
 0x4d7   :  { %v1520_v6 = vmul.f32 %v1519_v45, %v1413_v43 }
 0x4d9   :  { %v1521_v21 = vadd.f32 %v4959_v1, %v1520_v6 }
 0x4db   :  { %3911 = vmatpush3.msra.mxu1 %v1521_v21 }
 0x4dc   :  { %3913 = vmatmul.mubr.msk.f32.vlgmr.msra.gmra.mrb[16].mxu1 %vm789_vm11, %v1522_v22  ;;  %3915 = vmatprep.subr.mxu1 %v4601_v2 }
 0x4dd   :  { %3917 = vmatprep.mubr.msk.f32.mxu1 %vm4600_vm12, %v4601_v2 }
 0x5af   :  { %v1592_v47 = vpop.f32.mrb[16].mxu1 }
 0x5b0   :  { %v1596_v48 = vadd.f32 %v4807_v20, %v1592_v47  ;;  %v3914_v1 = vpop.f32.mrb[17].mxu1 }
 0x5b2   :  { %v5012_v50 = vadd.f32 %v1597_v32, %v1596_v48 }
 0x5b4   :  { %v5015_v53 = vmul.f32 %v1599_v49, %v5012_v50 }
 0x5b6   :  { %v1605_v54 = vand.u32 2139095040, %v5015_v53  ;;  %v1602_v57 = vand.u32 2147483647, %v5015_v53  ;;  %vm1604_vm5 = vcmp.lt.s32.totalorder %v5015_v53, 0  ;;  %vm1694_vm10 = vweird.f32 %v5015_v53 }
 0x5b8   :  { %v1606_v55 = vshrl.u32 %v1605_v54, 23  ;;  %v1609_v59 = vand.u32 8388607, %v1602_v57  ;;  %vm1603_vm6 = vcmp.le.f32.partialorder %v1602_v57, 0.7853982 }
 0x5ba   :  { %v3457_v56 = vadd.s32 4294967169, %v1606_v55  ;;  %v1610_v15 = vor.u32 8388608, %v1609_v59 }
 0x5bc   :  { %v1612_v28 = vadd.s32 1, %v3457_v56  ;;  %v1650_v51 = vshll.u32 %v1610_v15, 8 }
 0x5be   :  { %vm1613_vm0 = vcmp.gt.s32.totalorder %v1612_v28, 0 }
 0x5bf   :  { %v1614_v58 = vsel %vm1613_vm0, %v1612_v28, 0 }
 0x5c0   :  { %v1616_v20 = vand.u32 31, %v1614_v58  ;;  %v1615_v61 = vshrl.u32 %v1614_v58, 5 }
 0x5c2   :  { %v1617_v60 = vsub.s32 32, %v1616_v20  ;;  %v1619_v62 = vshll.u32 %v4594_v36, %v1616_v20  ;;  %v1622_v63 = vshll.u32 %v4595_v38, %v1616_v20  ;;  %v1625_v8 = vshll.u32 %v4596_v40, %v1616_v20 }
 0x5c3   :  { %v1628_v10 = vshll.u32 %v4597_v42, %v1616_v20  ;;  %v1631_v12 = vshll.u32 %v4598_v44, %v1616_v20  ;;  %vm1634_vm14 = vcmp.lt.s32.totalorder %v1615_v61, 1  ;;  %vm1637_vm15 = vcmp.lt.s32.totalorder %v1615_v61, 4 }
 0x5c4   :  { %v1620_v4 = vshrl.u32 %v4595_v38, %v1617_v60  ;;  %v1623_v34 = vshrl.u32 %v4596_v40, %v1617_v60  ;;  %v1626_v3 = vshrl.u32 %v4597_v42, %v1617_v60  ;;  %v1629_v46 = vshrl.u32 %v4598_v44, %v1617_v60 }
 0x5c5   :  { %v1632_v14 = vshrl.u32 %v4599_v52, %v1617_v60  ;;  %v1618_v5 = vshrl.u32 %v4594_v36, %v1617_v60  ;;  %vm1636_vm1 = vcmp.lt.s32.totalorder %v1615_v61, 3  ;;  %vm1635_vm2 = vcmp.lt.s32.totalorder %v1615_v61, 2 }
 0x5c6   :  { %v1621_v17 = vor.u32 %v1620_v4, %v1619_v62  ;;  %v1624_v19 = vor.u32 %v1623_v34, %v1622_v63  ;;  %v1627_v11 = vor.u32 %v1626_v3, %v1625_v8  ;;  %v1630_v16 = vor.u32 %v1629_v46, %v1628_v10 }
 0x5c7   :  { %v1633_v23 = vor.u32 %v1632_v14, %v1631_v12 }
 0x5c8   :  { %v1639_v24 = vsel %vm1637_vm15, %v1627_v11, 2102212464  ;;  %v1642_v26 = vsel %vm1634_vm14, %v1621_v17, %v1624_v19  ;;  %v1646_v27 = vsel %vm1634_vm14, %v1624_v19, %v1627_v11  ;;  %v1643_v30 = vsel %vm1637_vm15, %v1630_v16, 920167782 }
 0x5c9   :  { %v1647_v35 = vsel %vm1637_vm15, %v1633_v23, 1326507024  ;;  %v1644_v37 = vsel %vm1636_vm1, %v1627_v11, %v1643_v30  ;;  %v1638_v43 = vsel %vm1634_vm14, %v1618_v5, %v1621_v17  ;;  %v1640_v33 = vsel %vm1636_vm1, %v1624_v19, %v1639_v24 }
 0x5ca   :  { %v1648_v41 = vsel %vm1636_vm1, %v1630_v16, %v1647_v35  ;;  %v1645_v45 = vsel %vm1635_vm2, %v1642_v26, %v1644_v37  ;;  %v1641_v48 = vsel %vm1635_vm2, %v1638_v43, %v1640_v33 }
 0x5cb   :  { %v1649_v6 = vsel %vm1635_vm2, %v1646_v27, %v1648_v41  ;;  %v5035_v47 = vmul.u32.u64.low %v1650_v51, %v1645_v45  ;;  %v5036_v32 = vmul.u32.u64.high %v1650_v51, %v1645_v45, %v5035_v47  ;;  %v1657_v49 = vmul.u32 %v1650_v51, %v1641_v48 }
 0x5cc   :  { %v5032_v21 = vmul.u32.u64.low %v1650_v51, %v1649_v6  ;;  %v5033_v22 = vmul.u32.u64.high %v1650_v51, %v1649_v6, %v5032_v21  ;;  %v1600_v6 = vld [vmem:[%s5422_s2 + $0x60] sm:$0xff] }
 0x5cd   :  { %v1660_v1 = vadd.s32 1, %v5036_v32 }
 0x5ce   :  { %vm1659_vm3 = vc.u32 %v5033_v22, %v5035_v47  ;;  %v1658_v4 = vadd.s32 %v5035_v47, %v5033_v22  ;;  %v1840_v47 = vld [vmem:[#allocation2 + $0x180] sm:$0xff] }
 0x5cf   :  { %v1661_v54 = vsel %vm1659_vm3, %v1660_v1, %v5036_v32  ;;  %v1841_v32 = vld [vmem:[#allocation2 + $0x188] sm:$0xff] }
 0x5d0   :  { %v1662_v55 = vadd.s32 %v1661_v54, %v1657_v49  ;;  %v1709_v49 = vld [vmem:[%s5421_s1 + $0x58] sm:$0xff]  ;;  %v5054_v54 = vpack.c.bf16 %v1841_v32, %v1840_v47 }
 0x5d1   :  { %v2161_v47 = vld [vmem:[#allocation2 + $0x3b8] sm:$0xff] }
 0x5d2   :  { %v1663_v56 = vadd.s32 536870912, %v1662_v55 }
 0x5d4   :  { %v1664_v28 = vshrl.u32 %v1663_v56, 30  ;;  %v1710_v56 = vld [vmem:[%s5421_s1 + $0x60] sm:$0xff] }
 0x5d6   :  { %v1665_v58 = vshll.u32 %v1664_v28, 30  ;;  %v1688_v16 = vsub.s32 4, %v1664_v28 }
 0x5d8   :  { %v1666_v20 = vsub.s32 %v1662_v55, %v1665_v58  ;;  %v1689_v26 = vsel %vm1604_vm5, %v1688_v16, %v1664_v28  ;;  %v1842_v55 = vld [vmem:[#allocation2 + $0x190] sm:$0xff]  ;;  %v1844_v58 = vld [vmem:[#allocation2 + $0x1a0] sm:$0xff] }
 0x5d9   :  { %v1691_v5 = vsel %vm1603_vm6, 0, %v1689_v26  ;;  %v1927_v16 = vld [vmem:[#allocation2 + $0x1e0] sm:$0xff] }
 0x5da   :  { %v1668_v59 = vsub.s32 0, %v1666_v20  ;;  %v1695_v30 = vadd.s32 3, %v1691_v5  ;;  %v1929_v5 = vld [vmem:[#allocation2 + $0x1f0] sm:$0xff] }
 0x5dc   :  { %v3458_v60 = vmin.u32 %v1668_v59, %v1666_v20  ;;  %v1696_v35 = vand.u32 3, %v1695_v30  ;;  %v1711_v59 = vld [vmem:[%s5421_s1 + $0x68] sm:$0xff]  ;;  %v1930_v30 = vld [vmem:[#allocation2 + $0x1f8] sm:$0xff] }
 0x5de   :  { %v1670_v61 = vclz %v3458_v60  ;;  %vm1701_vm7 = vcmp.eq.s32.totalorder %v1696_v35, 2  ;;  %vm1698_vm8 = vcmp.eq.s32.totalorder %v1696_v35, 0  ;;  %vm1697_vm9 = vcmp.lt.s32.totalorder %v1696_v35, 2 }
 0x5e0   :  { %v3459_v62 = vadd.s32 4294967294, %v1670_v61  ;;  %v1846_v61 = vld [vmem:[#allocation2 + $0x1b0] sm:$0xff] }
 0x5e2   :  { %vm3460_vm4 = vcmp.lt.s32.totalorder %v3459_v62, 0 }
 0x5e3   :  { %v1673_v63 = vsel %vm3460_vm4, 0, %v3459_v62  ;;  %v1847_v62 = vld [vmem:[#allocation2 + $0x1b8] sm:$0xff] }
 0x5e4   :  { %v1674_v34 = vsub.s32 32, %v1673_v63  ;;  %v1678_v8 = vsub.s32 4294967266, %v1673_v63  ;;  %v1675_v3 = vshll.u32 %v1666_v20, %v1673_v63  ;;  %v1845_v20 = vld [vmem:[#allocation2 + $0x1a8] sm:$0xff]  ;;  %v1712_v63 = vld [vmem:[%s5421_s1 + $0x70] sm:$0xff] }
 0x5e5   :  { %v5074_v60 = vpack.c.bf16 %v1845_v20, %v1844_v58  ;;  %v2241_v58 = vld [vmem:[#allocation2 + $0x3e0] sm:$0xff]  ;;  %v2242_v20 = vld [vmem:[#allocation2 + $0x3e8] sm:$0xff] }
 0x5e6   :  { %v1676_v10 = vshrl.u32 %v1658_v4, %v1674_v34  ;;  %v1679_v46 = vadd.s32 127, %v1678_v8  ;;  %v5084_v4 = vpack.c.bf16 %v1847_v62, %v1846_v61  ;;  %v1713_v34 = vld [vmem:[%s5421_s1 + $0x78] sm:$0xff]  ;;  %v1714_v8 = vld [vmem:[%s5421_s1 + $0x80] sm:$0xff]  ;;  %v2243_v61 = vld [vmem:[#allocation2 + $0x3f0] sm:$0xff] }
 0x5e7   :  { %v2244_v62 = vld [vmem:[#allocation2 + $0x3f8] sm:$0xff] }
 0x5e8   :  { %v1677_v12 = vor.u32 %v1676_v10, %v1675_v3  ;;  %v1680_v14 = vshll.u32 %v1679_v46, 23  ;;  %v1715_v3 = vld [vmem:[%s5421_s1 + $0x88] sm:$0xff]  ;;  %v1923_v10 = vld [vmem:[#allocation2 + $0x1c0] sm:$0xff] }
 0x5e9   :  { %v1924_v46 = vld [vmem:[#allocation2 + $0x1c8] sm:$0xff] }
 0x5ea   :  { %v1681_v15 = vor.u32 4788187, %v1680_v14  ;;  %v1684_v19 = vcvt.s32.f32 %v1677_v12  ;;  %v4312_v12 = vpack.c.bf16 %v1924_v46, %v1923_v10  ;;  %v1925_v14 = vld [vmem:[#allocation2 + $0x1d0] sm:$0xff] }
 0x5ec   :  { %v1682_v17 = vand.u32 2147483647, %v1681_v15  ;;  %v1926_v15 = vld [vmem:[#allocation2 + $0x1d8] sm:$0xff] }
 0x5ee   :  { %v1685_v11 = vmul.f32 %v1684_v19, %v1682_v17 }
 0x5f0   :  { %v1686_v23 = vxor.u32 2147483648, %v1685_v11 }
 0x5f2   :  { %v1687_v24 = vsel %vm1604_vm5, %v1686_v23, %v1685_v11  ;;  %v4315_v11 = vpack.c.bf16 %v1926_v15, %v1925_v14  ;;  %v1928_v23 = vld [vmem:[#allocation2 + $0x1e8] sm:$0xff] }
 0x5f3   :  { %v1690_v27 = vsel %vm1603_vm6, %v5015_v53, %v1687_v24  ;;  %v1843_v53 = vld [vmem:[#allocation2 + $0x198] sm:$0xff] }
 0x5f4   :  { %4550 = vcosq.f32 %v1690_v27  ;;  %v5064_v28 = vpack.c.bf16 %v1843_v53, %v1842_v55  ;;  %v2239_v55 = vld [vmem:[#allocation2 + $0x3d0] sm:$0xff]  ;;  %v2240_v53 = vld [vmem:[#allocation2 + $0x3d8] sm:$0xff] }
 0x5f5   :  { %4552 = vsinq.f32 %v1690_v27  ;;  %v4318_v27 = vpack.c.bf16 %v1928_v23, %v1927_v16 }
 0x5fe   :  { %v4551_v37 = vpop.eup %4550 }
 0x5ff   :  { %v4553_v41 = vpop.eup %4552  ;;  %v1702_v51 = vxor.u32 2147483648, %v4551_v37 }
 0x600   :  { %v1699_v43 = vxor.u32 2147483648, %v4553_v41 }
 0x601   :  { %v1703_v33 = vsel %vm1701_vm7, %v1702_v51, %v4553_v41  ;;  %v4321_v41 = vpack.c.bf16 %v1930_v30, %v1929_v5 }
 0x602   :  { %v1700_v45 = vsel %vm1698_vm8, %v4551_v37, %v1699_v43 }
 0x603   :  { %v1704_v57 = vsel %vm1697_vm9, %v1700_v45, %v1703_v33 }
 0x604   :  { %v1705_v21 = vsel %vm1694_vm10, nan, %v1704_v57 }
 0x605   :  { %v1706_v22 = vmul.f32 %v1705_v21, %v1705_v21 }
 0x607   :  { %v1707_v48 = vmul.f32 %v1706_v22, %v1600_v6 }
 0x609   :  { %v1708_v1 = vadd.f32 %v1707_v48, %v5012_v50  ;;  %v2237_v48 = vld [vmem:[#allocation2 + $0x3c0] sm:$0xff] }
 0x60b   :  { %3916 = vmatpush3.msra.mxu1 %v1708_v1  ;;  %v2238_v1 = vld [vmem:[#allocation2 + $0x3c8] sm:$0xff] }
 0x60c   :  { %3918 = vmatmul.mubr.msk.f32.vlgmr.msra.gmra.mrb[18].mxu1 %vm789_vm11, %v1709_v49  ;;  %4299 = vmatprep.subr.bf16.mxu1 %v4593_v0  ;;  %v5145_v49 = vpack.c.bf16 %v2238_v1, %v2237_v48 }
 0x60d   :  { %3920 = vmatprep.mubr.msk.f32.mxu1 %vm4600_vm12, %v4601_v2  ;;  %4301 = vmatpush3.bf16.msra.mxu1 %v5054_v54 }
 0x60e   :  { %4302 = vmatprep.subr.bf16.mxu1 %v4593_v0 }
 0x610   :  { %3921 = vmatmul.mubr.msk.f32.gmra.mrb[20].mxu1 %vm789_vm11, %v1710_v56  ;;  %v5150_v56 = vpack.c.bf16 %v2240_v53, %v2239_v55 }
 0x611   :  { %3923 = vmatprep.mubr.msk.f32.mxu1 %vm4600_vm12, %v4601_v2  ;;  %4304 = vmatpush3.bf16.msra.mxu1 %v5064_v28 }
 0x612   :  { %4305 = vmatprep.subr.bf16.mxu1 %v4593_v0 }
 0x614   :  { %3924 = vmatmul.mubr.msk.f32.gmra.mrb[22].mxu1 %vm789_vm11, %v1711_v59  ;;  %v5156_v59 = vpack.c.bf16 %v2242_v20, %v2241_v58 }
 0x615   :  { %3926 = vmatprep.mubr.msk.f32.mxu1 %vm4600_vm12, %v4601_v2  ;;  %4307 = vmatpush3.bf16.msra.mxu1 %v5074_v60 }
 0x616   :  { %4308 = vmatprep.subr.bf16.mxu1 %v4593_v0 }
 0x618   :  { %3927 = vmatmul.mubr.msk.f32.gmra.mrb[24].mxu1 %vm789_vm11, %v1712_v63  ;;  %v5160_v63 = vpack.c.bf16 %v2244_v62, %v2243_v61 }
 0x619   :  { %3929 = vmatprep.mubr.msk.f32.mxu1 %vm4600_vm12, %v4601_v2  ;;  %4310 = vmatpush3.bf16.msra.mxu1 %v5084_v4 }
 0x61a   :  { %4311 = vmatprep.subr.bf16.mxu1 %v4593_v0 }
 0x61c   :  { %3930 = vmatmul.mubr.msk.f32.gmra.mrb[26].mxu1 %vm789_vm11, %v1713_v34  ;;  %v1837_v34 = vld [vmem:[%s5422_s2 + $0x68] sm:$0xff] }
 0x61d   :  { %3932 = vmatprep.mubr.msk.f32.mxu1 %vm4600_vm12, %v4601_v2 }
 0x620   :  { %3933 = vmatmul.mubr.msk.f32.gmra.mrb[28].mxu1 %vm789_vm11, %v1714_v8 }
 0x621   :  { %3935 = vmatprep.mubr.msk.f32.mxu1 %vm4600_vm12, %v4601_v2 }
 0x624   :  { %3936 = vmatmul.mubr.msk.f32.gmra.mrb[30].mxu1 %vm789_vm11, %v1715_v3  ;;  %v2319_v3 = vld [vmem:[%s5422_s2 + $0x70] sm:$0xff] }
 0x625   :  { %3954 = vmatprep.mubr.msk.f32.mxu1 %vm4600_vm12, %v4601_v2 }
 0x6df   :  { %v1803_v17 = vpop.f32.mrb[18].mxu1 }
 0x6e0   :  { %v3919_v19 = vpop.f32.mrb[19].mxu1  ;;  %3955 = vmatmul.mubr.msk.f32.vlgmr.msra.gmra.mrb[24].mxu1 %vm922_vm13, %v1803_v17 }
 0x6e1   :  { %4313 = vmatpush3.bf16.msra.mxu1 %v4312_v12  ;;  %3973 = vmatprep.mubr.msk.f32.mxu1 %vm4600_vm12, %v4601_v2 }
 0x6e2   :  { %4314 = vmatprep.subr.bf16.mxu1 %v4593_v0 }
 0x6e3   :  { %v1808_v24 = vpop.f32.mrb[20].mxu1 }
 0x6e4   :  { %v3922_v26 = vpop.f32.mrb[21].mxu1 }
 0x6e5   :  { %4316 = vmatpush3.bf16.msra.mxu1 %v4315_v11 }
 0x6e6   :  { %4317 = vmatprep.subr.bf16.mxu1 %v4593_v0 }
 0x6e7   :  { %v1813_v35 = vpop.f32.mrb[22].mxu1 }
 0x6e8   :  { %v3925_v37 = vpop.f32.mrb[23].mxu1 }
 0x6e9   :  { %4319 = vmatpush3.bf16.msra.mxu1 %v4318_v27 }
 0x6ea   :  { %4320 = vmatprep.subr.bf16.mxu1 %v4593_v0 }
 0x6ed   :  { %4322 = vmatpush3.bf16.msra.mxu1 %v4321_v41 }
 0x6ee   :  { %4323 = vmatprep.subr.bf16.mxu1 %v4593_v0 }
 0x6ef   :  { %v1823_v51 = vpop.f32.mrb[26].mxu1 }
 0x6f0   :  { %3974 = vmatmul.mubr.msk.f32.vlgmr.msra.gmra.mrb[24].mxu1 %vm922_vm13, %v1808_v24  ;;  %v3931_v43 = vpop.f32.mrb[27].mxu1 }
 0x6f1   :  { %4325 = vmatpush3.bf16.msra.mxu1 %v4850_v7  ;;  %3992 = vmatprep.mubr.msk.f32.mxu1 %vm4600_vm12, %v4601_v2  ;;  %v2154_v7 = vld [vmem:[#allocation2 + $0x380] sm:$0xff] }
 0x6f2   :  { %4326 = vmatprep.subr.bf16.mxu1 %v4593_v0 }
 0x6f3   :  { %v1828_v33 = vpop.f32.mrb[28].mxu1 }
 0x6f4   :  { %v3934_v45 = vpop.f32.mrb[29].mxu1 }
 0x6f5   :  { %4328 = vmatpush3.bf16.msra.mxu1 %v4860_v9  ;;  %v2155_v9 = vld [vmem:[#allocation2 + $0x388] sm:$0xff] }
 0x6f6   :  { %4329 = vmatprep.subr.bf16.mxu1 %v4593_v0 }
 0x6f7   :  { %v1833_v57 = vpop.f32.mrb[30].mxu1 }
 0x6f8   :  { %v3937_v6 = vpop.f32.mrb[31].mxu1 }
 0x6f9   :  { %4331 = vmatpush3.bf16.msra.mxu1 %v4870_v13  ;;  %v4348_v13 = vpack.c.bf16 %v2155_v9, %v2154_v7 }
 0x6fa   :  { %4332 = vmatprep.subr.bf16.mxu1 %v4593_v0 }
 0x6fd   :  { %4334 = vmatpush3.bf16.msra.mxu1 %v4880_v18  ;;  %v2156_v18 = vld [vmem:[#allocation2 + $0x390] sm:$0xff] }
 0x6fe   :  { %4335 = vmatprep.subr.bf16.mxu1 %v4593_v0 }
 0x700   :  { %3993 = vmatmul.mubr.msk.f32.vlgmr.msra.gmra.mrb[24].mxu1 %vm922_vm13, %v1813_v35 }
 0x701   :  { %4337 = vmatpush3.bf16.msra.mxu1 %v4930_v25  ;;  %4011 = vmatprep.mubr.msk.f32.mxu1 %vm4600_vm12, %v4601_v2  ;;  %v2157_v25 = vld [vmem:[#allocation2 + $0x398] sm:$0xff] }
 0x702   :  { %4338 = vmatprep.subr.bf16.mxu1 %v4593_v0  ;;  %v4351_v21 = vpack.c.bf16 %v2157_v25, %v2156_v18 }
 0x705   :  { %4340 = vmatpush3.bf16.msra.mxu1 %v4935_v29  ;;  %v2158_v29 = vld [vmem:[#allocation2 + $0x3a0] sm:$0xff] }
 0x706   :  { %4341 = vmatprep.subr.bf16.mxu1 %v4593_v0 }
 0x709   :  { %4343 = vmatpush3.bf16.msra.mxu1 %v4941_v31  ;;  %v2159_v31 = vld [vmem:[#allocation2 + $0x3a8] sm:$0xff] }
 0x70a   :  { %4344 = vmatprep.subr.bf16.mxu1 %v4593_v0  ;;  %v4354_v22 = vpack.c.bf16 %v2159_v31, %v2158_v29 }
 0x70d   :  { %4346 = vmatpush3.bf16.msra.mxu1 %v4945_v39  ;;  %v2160_v39 = vld [vmem:[#allocation2 + $0x3b0] sm:$0xff] }
 0x70e   :  { %4347 = vmatprep.subr.bf16.mxu1 %v4593_v0  ;;  %v4357_v32 = vpack.c.bf16 %v2161_v47, %v2160_v39 }
 0x710   :  { %4012 = vmatmul.mubr.msk.f32.vlgmr.msra.gmra.mrb[24].mxu1 %vm922_vm13, %v1823_v51 }
 0x711   :  { %4349 = vmatpush3.bf16.msra.mxu1 %v4348_v13  ;;  %4030 = vmatprep.mubr.msk.f32.mxu1 %vm4600_vm12, %v4601_v2 }
 0x712   :  { %4350 = vmatprep.subr.bf16.mxu1 %v4593_v0 }
 0x715   :  { %4352 = vmatpush3.bf16.msra.mxu1 %v4351_v21 }
 0x716   :  { %4353 = vmatprep.subr.bf16.mxu1 %v4593_v0 }
 0x719   :  { %4355 = vmatpush3.bf16.msra.mxu1 %v4354_v22 }
 0x71a   :  { %4356 = vmatprep.subr.bf16.mxu1 %v4593_v0 }
 0x71d   :  { %4358 = vmatpush3.bf16.msra.mxu1 %v4357_v32 }
 0x71e   :  { %4359 = vmatprep.subr.bf16.mxu1 %v4593_v0 }
 0x720   :  { %4031 = vmatmul.mubr.msk.f32.vlgmr.msra.gmra.mrb[24].mxu1 %vm922_vm13, %v1828_v33 }
 0x721   :  { %4361 = vmatpush3.bf16.msra.mxu1 %v5145_v49  ;;  %4049 = vmatprep.mubr.msk.f32.mxu1 %vm4600_vm12, %v4601_v2 }
 0x722   :  { %4362 = vmatprep.subr.bf16.mxu1 %v4593_v0 }
 0x725   :  { %4364 = vmatpush3.bf16.msra.mxu1 %v5150_v56 }
 0x726   :  { %4365 = vmatprep.subr.bf16.mxu1 %v4593_v0 }
 0x729   :  { %4367 = vmatpush3.bf16.msra.mxu1 %v5156_v59 }
 0x72a   :  { %4368 = vmatprep.subr.bf16.mxu1 %v4593_v0 }
 0x72d   :  { %4370 = vmatpush3.bf16.msra.mxu1 %v5160_v63 }
 0x72e   :  { %4443 = vmatprep.subr.mxu1 %v4601_v2 }
 0x730   :  { %4050 = vmatmul.mubr.msk.f32.vlgmr.msra.gmra.mrb[24].mxu1 %vm922_vm13, %v1833_v57 }
 0x731   :  { %4074 = vmatprep.mubr.msk.f32.mxu1 %vm4600_vm12, %v4601_v2 }
 0x803   :  { %v2314_v8 = vpop.f32.mrb[24].mxu1 }
 0x804   :  { %v5174_v10 = vadd.f32 %v2314_v8, %v1837_v34  ;;  %v4051_v46 = vpop.f32.mrb[25].mxu1 }
 0x806   :  { %v5177_v12 = vmul.f32 %v5174_v10, %v2319_v3 }
 0x808   :  { %v2325_v14 = vand.u32 2139095040, %v5177_v12  ;;  %v2322_v11 = vand.u32 2147483647, %v5177_v12  ;;  %vm2324_vm5 = vcmp.lt.s32.totalorder %v5177_v12, 0  ;;  %vm2414_vm10 = vweird.f32 %v5177_v12 }
 0x80a   :  { %v2326_v15 = vshrl.u32 %v2325_v14, 23  ;;  %v2329_v24 = vand.u32 8388607, %v2322_v11  ;;  %vm2323_vm6 = vcmp.le.f32.partialorder %v2322_v11, 0.7853982 }
 0x80c   :  { %v3474_v17 = vadd.s32 4294967169, %v2326_v15  ;;  %v2330_v6 = vor.u32 8388608, %v2329_v24 }
 0x80e   :  { %v2332_v19 = vadd.s32 1, %v3474_v17  ;;  %v2370_v1 = vshll.u32 %v2330_v6, 8 }
 0x810   :  { %vm2333_vm0 = vcmp.gt.s32.totalorder %v2332_v19, 0 }
 0x811   :  { %v2334_v16 = vsel %vm2333_vm0, %v2332_v19, 0 }
 0x812   :  { %v2336_v23 = vand.u32 31, %v2334_v16  ;;  %v2335_v27 = vshrl.u32 %v2334_v16, 5 }
 0x814   :  { %v2337_v26 = vsub.s32 32, %v2336_v23  ;;  %v2339_v5 = vshll.u32 %v4594_v36, %v2336_v23  ;;  %v2342_v30 = vshll.u32 %v4595_v38, %v2336_v23  ;;  %v2345_v41 = vshll.u32 %v4596_v40, %v2336_v23 }
 0x815   :  { %v2348_v43 = vshll.u32 %v4597_v42, %v2336_v23  ;;  %v2351_v45 = vshll.u32 %v4598_v44, %v2336_v23  ;;  %vm2354_vm14 = vcmp.lt.s32.totalorder %v2335_v27, 1  ;;  %vm2357_vm15 = vcmp.lt.s32.totalorder %v2335_v27, 4 }
 0x816   :  { %v2340_v35 = vshrl.u32 %v4595_v38, %v2337_v26  ;;  %v2343_v37 = vshrl.u32 %v4596_v40, %v2337_v26  ;;  %v2346_v51 = vshrl.u32 %v4597_v42, %v2337_v26  ;;  %v2349_v33 = vshrl.u32 %v4598_v44, %v2337_v26 }
 0x817   :  { %v2352_v57 = vshrl.u32 %v4599_v52, %v2337_v26  ;;  %v2338_v22 = vshrl.u32 %v4594_v36, %v2337_v26  ;;  %vm2356_vm1 = vcmp.lt.s32.totalorder %v2335_v27, 3  ;;  %vm2355_vm2 = vcmp.lt.s32.totalorder %v2335_v27, 2 }
 0x818   :  { %v2341_v7 = vor.u32 %v2340_v35, %v2339_v5  ;;  %v2344_v9 = vor.u32 %v2343_v37, %v2342_v30  ;;  %v2347_v13 = vor.u32 %v2346_v51, %v2345_v41  ;;  %v2350_v18 = vor.u32 %v2349_v33, %v2348_v43 }
 0x819   :  { %v2353_v25 = vor.u32 %v2352_v57, %v2351_v45 }
 0x81a   :  { %v2359_v21 = vsel %vm2357_vm15, %v2347_v13, 2102212464  ;;  %v2362_v29 = vsel %vm2354_vm14, %v2341_v7, %v2344_v9  ;;  %v2366_v31 = vsel %vm2354_vm14, %v2344_v9, %v2347_v13  ;;  %v2363_v39 = vsel %vm2357_vm15, %v2350_v18, 920167782 }
 0x81b   :  { %v2367_v47 = vsel %vm2357_vm15, %v2353_v25, 1326507024  ;;  %v2364_v32 = vsel %vm2356_vm1, %v2347_v13, %v2363_v39  ;;  %v2358_v55 = vsel %vm2354_vm14, %v2338_v22, %v2341_v7  ;;  %v2360_v53 = vsel %vm2356_vm1, %v2344_v9, %v2359_v21 }
 0x81c   :  { %v2368_v48 = vsel %vm2356_vm1, %v2350_v18, %v2367_v47  ;;  %v2365_v58 = vsel %vm2355_vm2, %v2362_v29, %v2364_v32  ;;  %v2361_v3 = vsel %vm2355_vm2, %v2358_v55, %v2360_v53 }
 0x81d   :  { %v2369_v20 = vsel %vm2355_vm2, %v2366_v31, %v2368_v48  ;;  %v5197_v34 = vmul.u32.u64.low %v2370_v1, %v2365_v58  ;;  %v5198_v8 = vmul.u32.u64.high %v2370_v1, %v2365_v58, %v5197_v34  ;;  %v2377_v14 = vmul.u32 %v2370_v1, %v2361_v3 }
 0x81e   :  { %v5194_v61 = vmul.u32.u64.low %v2370_v1, %v2369_v20  ;;  %v5195_v62 = vmul.u32.u64.high %v2370_v1, %v2369_v20, %v5194_v61 }
 0x81f   :  { %v2380_v46 = vadd.s32 1, %v5198_v8  ;;  %v2320_v61 = vld [vmem:[%s5422_s2 + $0x78] sm:$0xff] }
 0x820   :  { %vm2379_vm3 = vc.u32 %v5195_v62, %v5197_v34  ;;  %v2378_v37 = vadd.s32 %v5197_v34, %v5195_v62 }
 0x821   :  { %v2381_v15 = vsel %vm2379_vm3, %v2380_v46, %v5198_v8  ;;  %v2429_v46 = vld [vmem:[%s5421_s1 + $0xd0] sm:$0xff] }
 0x822   :  { %v2382_v17 = vadd.s32 %v2381_v15, %v2377_v14  ;;  %v2504_v14 = vld [vmem:[%s5422_s2 + $0x80] sm:$0xff] }
 0x824   :  { %v2383_v19 = vadd.s32 536870912, %v2382_v17 }
 0x826   :  { %v2384_v16 = vshrl.u32 %v2383_v19, 30 }
 0x828   :  { %v2385_v23 = vshll.u32 %v2384_v16, 30  ;;  %v2408_v25 = vsub.s32 4, %v2384_v16 }
 0x82a   :  { %v2386_v24 = vsub.s32 %v2382_v17, %v2385_v23  ;;  %v2409_v31 = vsel %vm2324_vm5, %v2408_v25, %v2384_v16  ;;  %v2506_v17 = vld [vmem:[%s5422_s2 + $0x88] sm:$0xff] }
 0x82b   :  { %v2411_v39 = vsel %vm2323_vm6, 0, %v2409_v31 }
 0x82c   :  { %v2388_v26 = vsub.s32 0, %v2386_v24  ;;  %v2415_v47 = vadd.s32 3, %v2411_v39 }
 0x82e   :  { %v3475_v27 = vmin.u32 %v2388_v26, %v2386_v24  ;;  %v2416_v32 = vand.u32 3, %v2415_v47 }
 0x830   :  { %v2390_v5 = vclz %v3475_v27  ;;  %vm2421_vm7 = vcmp.eq.s32.totalorder %v2416_v32, 2  ;;  %vm2418_vm8 = vcmp.eq.s32.totalorder %v2416_v32, 0  ;;  %vm2417_vm9 = vcmp.lt.s32.totalorder %v2416_v32, 2 }
 0x832   :  { %v3476_v30 = vadd.s32 4294967294, %v2390_v5 }
 0x834   :  { %vm3477_vm4 = vcmp.lt.s32.totalorder %v3476_v30, 0 }
 0x835   :  { %v2393_v35 = vsel %vm3477_vm4, 0, %v3476_v30 }
 0x836   :  { %v2394_v41 = vsub.s32 32, %v2393_v35  ;;  %v2398_v51 = vsub.s32 4294967266, %v2393_v35  ;;  %v2395_v43 = vshll.u32 %v2386_v24, %v2393_v35 }
 0x838   :  { %v2396_v33 = vshrl.u32 %v2378_v37, %v2394_v41  ;;  %v2399_v45 = vadd.s32 127, %v2398_v51 }
 0x83a   :  { %v2397_v57 = vor.u32 %v2396_v33, %v2395_v43  ;;  %v2400_v6 = vshll.u32 %v2399_v45, 23 }
 0x83c   :  { %v2401_v7 = vor.u32 4788187, %v2400_v6  ;;  %v2404_v13 = vcvt.s32.f32 %v2397_v57 }
 0x83e   :  { %v2402_v9 = vand.u32 2147483647, %v2401_v7 }
 0x840   :  { %v2405_v18 = vmul.f32 %v2404_v13, %v2402_v9 }
 0x842   :  { %v2406_v21 = vxor.u32 2147483648, %v2405_v18 }
 0x844   :  { %v2407_v29 = vsel %vm2324_vm5, %v2406_v21, %v2405_v18 }
 0x845   :  { %v2410_v22 = vsel %vm2323_vm6, %v5177_v12, %v2407_v29 }
 0x846   :  { %4554 = vcosq.f32 %v2410_v22 }
 0x847   :  { %4556 = vsinq.f32 %v2410_v22 }
 0x850   :  { %v4555_v48 = vpop.eup %4554 }
 0x851   :  { %v4557_v1 = vpop.eup %4556  ;;  %v2422_v55 = vxor.u32 2147483648, %v4555_v48 }
 0x852   :  { %v2419_v53 = vxor.u32 2147483648, %v4557_v1 }
 0x853   :  { %v2423_v58 = vsel %vm2421_vm7, %v2422_v55, %v4557_v1 }
 0x854   :  { %v2420_v20 = vsel %vm2418_vm8, %v4555_v48, %v2419_v53 }
 0x855   :  { %v2424_v11 = vsel %vm2417_vm9, %v2420_v20, %v2423_v58 }
 0x856   :  { %v2425_v62 = vsel %vm2414_vm10, nan, %v2424_v11 }
 0x857   :  { %v2426_v34 = vmul.f32 %v2425_v62, %v2425_v62 }
 0x859   :  { %v2427_v8 = vmul.f32 %v2426_v34, %v2320_v61 }
 0x85b   :  { %v2428_v3 = vadd.f32 %v5174_v10, %v2427_v8 }
 0x85d   :  { %4053 = vmatpush3.msra.mxu0 %v2428_v3 }
 0x85e   :  { %4055 = vmatmul.mubr.msk.f32.vlgmr.msra.gmra.mrb[6].mxu0 %vm789_vm11, %v2429_v46  ;;  %4057 = vmatprep.subr.mxu0 %v4601_v2 }
 0x85f   :  { %4059 = vmatprep.mubr.msk.f32.mxu0 %vm4600_vm12, %v4601_v2 }
 0x931   :  { %v2499_v12 = vpop.f32.mrb[6].mxu0 }
 0x932   :  { %v2503_v15 = vadd.f32 %v2499_v12, %v5012_v50  ;;  %v4056_v10 = vpop.f32.mrb[7].mxu0 }
 0x934   :  { %v5227_v19 = vadd.f32 %v2504_v14, %v2503_v15 }
 0x936   :  { %v5230_v16 = vmul.f32 %v2506_v17, %v5227_v19 }
 0x938   :  { %v2512_v23 = vand.u32 2139095040, %v5230_v16  ;;  %v2509_v5 = vand.u32 2147483647, %v5230_v16  ;;  %vm2511_vm5 = vcmp.lt.s32.totalorder %v5230_v16, 0  ;;  %vm2601_vm10 = vweird.f32 %v5230_v16 }
 0x93a   :  { %v2513_v24 = vshrl.u32 %v2512_v23, 23  ;;  %v2516_v35 = vand.u32 8388607, %v2509_v5  ;;  %vm2510_vm6 = vcmp.le.f32.partialorder %v2509_v5, 0.7853982 }
 0x93c   :  { %v3479_v26 = vadd.s32 4294967169, %v2513_v24  ;;  %v2517_v25 = vor.u32 8388608, %v2516_v35 }
 0x93e   :  { %v2519_v27 = vadd.s32 1, %v3479_v26  ;;  %v2557_v11 = vshll.u32 %v2517_v25, 8 }
 0x940   :  { %vm2520_vm0 = vcmp.gt.s32.totalorder %v2519_v27, 0 }
 0x941   :  { %v2521_v30 = vsel %vm2520_vm0, %v2519_v27, 0 }
 0x942   :  { %v2523_v50 = vand.u32 31, %v2521_v30  ;;  %v2522_v41 = vshrl.u32 %v2521_v30, 5 }
 0x944   :  { %v2524_v37 = vsub.s32 32, %v2523_v50  ;;  %v2526_v51 = vshll.u32 %v4594_v36, %v2523_v50  ;;  %v2529_v43 = vshll.u32 %v4595_v38, %v2523_v50  ;;  %v2532_v57 = vshll.u32 %v4596_v40, %v2523_v50 }
 0x945   :  { %v2535_v7 = vshll.u32 %v4597_v42, %v2523_v50  ;;  %v2538_v13 = vshll.u32 %v4598_v44, %v2523_v50  ;;  %vm2541_vm14 = vcmp.lt.s32.totalorder %v2522_v41, 1  ;;  %vm2544_vm15 = vcmp.lt.s32.totalorder %v2522_v41, 4 }
 0x946   :  { %v2527_v33 = vshrl.u32 %v4595_v38, %v2524_v37  ;;  %v2530_v45 = vshrl.u32 %v4596_v40, %v2524_v37  ;;  %v2533_v6 = vshrl.u32 %v4597_v42, %v2524_v37  ;;  %v2536_v9 = vshrl.u32 %v4598_v44, %v2524_v37 }
 0x947   :  { %v2539_v18 = vshrl.u32 %v4599_v52, %v2524_v37  ;;  %v2525_v1 = vshrl.u32 %v4594_v36, %v2524_v37  ;;  %vm2543_vm1 = vcmp.lt.s32.totalorder %v2522_v41, 3  ;;  %vm2542_vm2 = vcmp.lt.s32.totalorder %v2522_v41, 2 }
 0x948   :  { %v2528_v21 = vor.u32 %v2527_v33, %v2526_v51  ;;  %v2531_v29 = vor.u32 %v2530_v45, %v2529_v43  ;;  %v2534_v31 = vor.u32 %v2533_v6, %v2532_v57  ;;  %v2537_v22 = vor.u32 %v2536_v9, %v2535_v7 }
 0x949   :  { %v2540_v39 = vor.u32 %v2539_v18, %v2538_v13 }
 0x94a   :  { %v2546_v47 = vsel %vm2544_vm15, %v2534_v31, 2102212464  ;;  %v2549_v32 = vsel %vm2541_vm14, %v2528_v21, %v2531_v29  ;;  %v2553_v48 = vsel %vm2541_vm14, %v2531_v29, %v2534_v31  ;;  %v2550_v55 = vsel %vm2544_vm15, %v2537_v22, 920167782 }
 0x94b   :  { %v2554_v53 = vsel %vm2544_vm15, %v2540_v39, 1326507024  ;;  %v2551_v58 = vsel %vm2543_vm1, %v2534_v31, %v2550_v55  ;;  %v2545_v61 = vsel %vm2541_vm14, %v2525_v1, %v2528_v21  ;;  %v2547_v62 = vsel %vm2543_vm1, %v2531_v29, %v2546_v47 }
 0x94c   :  { %v2555_v20 = vsel %vm2543_vm1, %v2537_v22, %v2554_v53  ;;  %v2552_v34 = vsel %vm2542_vm2, %v2549_v32, %v2551_v58  ;;  %v2548_v15 = vsel %vm2542_vm2, %v2545_v61, %v2547_v62 }
 0x94d   :  { %v2556_v8 = vsel %vm2542_vm2, %v2553_v48, %v2555_v20  ;;  %v5250_v12 = vmul.u32.u64.low %v2557_v11, %v2552_v34  ;;  %v5251_v14 = vmul.u32.u64.high %v2557_v11, %v2552_v34, %v5250_v12  ;;  %v2564_v17 = vmul.u32 %v2557_v11, %v2548_v15  ;;  %v2748_v15 = vld [vmem:[#allocation2 + $0x108] sm:$0xff] }
 0x94e   :  { %v5247_v3 = vmul.u32.u64.low %v2557_v11, %v2556_v8  ;;  %v5248_v46 = vmul.u32.u64.high %v2557_v11, %v2556_v8, %v5247_v3  ;;  %v2507_v8 = vld [vmem:[%s5422_s2 + $0x90] sm:$0xff] }
 0x94f   :  { %v2567_v10 = vadd.s32 1, %v5251_v14 }
 0x950   :  { %vm2566_vm3 = vc.u32 %v5248_v46, %v5250_v12  ;;  %v2565_v33 = vadd.s32 %v5250_v12, %v5248_v46 }
 0x951   :  { %v2568_v23 = vsel %vm2566_vm3, %v2567_v10, %v5251_v14  ;;  %v2747_v14 = vld [vmem:[#allocation2 + $0x100] sm:$0xff] }
 0x952   :  { %v2569_v24 = vadd.s32 %v2568_v23, %v2564_v17  ;;  %v2616_v17 = vld [vmem:[%s5421_s1 + $0x90] sm:$0xff]  ;;  %v4372_v23 = vpack.c.bf16 %v2748_v15, %v2747_v14  ;;  %v3144_v15 = vld [vmem:[#allocation2 + $0x440] sm:$0xff] }
 0x954   :  { %v2570_v26 = vadd.s32 536870912, %v2569_v24 }
 0x956   :  { %v2571_v27 = vshrl.u32 %v2570_v26, 30  ;;  %v2750_v26 = vld [vmem:[#allocation2 + $0x118] sm:$0xff] }
 0x958   :  { %v2572_v30 = vshll.u32 %v2571_v27, 30  ;;  %v2595_v22 = vsub.s32 4, %v2571_v27 }
 0x95a   :  { %v2573_v50 = vsub.s32 %v2569_v24, %v2572_v30  ;;  %v2596_v32 = vsel %vm2511_vm5, %v2595_v22, %v2571_v27  ;;  %v2749_v24 = vld [vmem:[#allocation2 + $0x110] sm:$0xff]  ;;  %v2617_v27 = vld [vmem:[%s5421_s1 + $0x98] sm:$0xff]  ;;  %v2622_v30 = vld [vmem:[%s5421_s1 + $0xc0] sm:$0xff] }
 0x95b   :  { %v2598_v1 = vsel %vm2510_vm6, 0, %v2596_v32  ;;  %v2835_v32 = vld [vmem:[#allocation2 + $0x168] sm:$0xff] }
 0x95c   :  { %v2575_v35 = vsub.s32 0, %v2573_v50  ;;  %v2602_v55 = vadd.s32 3, %v2598_v1 }
 0x95e   :  { %v3480_v37 = vmin.u32 %v2575_v35, %v2573_v50  ;;  %v2603_v53 = vand.u32 3, %v2602_v55  ;;  %v2751_v35 = vld [vmem:[#allocation2 + $0x120] sm:$0xff] }
 0x960   :  { %v2577_v41 = vclz %v3480_v37  ;;  %vm2608_vm7 = vcmp.eq.s32.totalorder %v2603_v53, 2  ;;  %vm2605_vm8 = vcmp.eq.s32.totalorder %v2603_v53, 0  ;;  %vm2604_vm9 = vcmp.lt.s32.totalorder %v2603_v53, 2  ;;  %v2752_v37 = vld [vmem:[#allocation2 + $0x128] sm:$0xff] }
 0x962   :  { %v3481_v51 = vadd.s32 4294967294, %v2577_v41  ;;  %v2618_v41 = vld [vmem:[%s5421_s1 + $0xa0] sm:$0xff] }
 0x964   :  { %vm3482_vm4 = vcmp.lt.s32.totalorder %v3481_v51, 0 }
 0x965   :  { %v2580_v43 = vsel %vm3482_vm4, 0, %v3481_v51  ;;  %v4378_v51 = vpack.c.bf16 %v2752_v37, %v2751_v35  ;;  %v3151_v35 = vld [vmem:[#allocation2 + $0x478] sm:$0xff] }
 0x966   :  { %v2581_v45 = vsub.s32 32, %v2580_v43  ;;  %v2585_v57 = vsub.s32 4294967266, %v2580_v43  ;;  %v2582_v6 = vshll.u32 %v2573_v50, %v2580_v43  ;;  %v4375_v50 = vpack.c.bf16 %v2750_v26, %v2749_v24  ;;  %v2753_v43 = vld [vmem:[#allocation2 + $0x130] sm:$0xff]  ;;  %v3148_v26 = vld [vmem:[#allocation2 + $0x460] sm:$0xff] }
 0x968   :  { %v2583_v7 = vshrl.u32 %v2565_v33, %v2581_v45  ;;  %v2586_v9 = vadd.s32 127, %v2585_v57  ;;  %v2754_v33 = vld [vmem:[#allocation2 + $0x138] sm:$0xff]  ;;  %v2619_v45 = vld [vmem:[%s5421_s1 + $0xa8] sm:$0xff] }
 0x969   :  { %v4381_v57 = vpack.c.bf16 %v2754_v33, %v2753_v43 }
 0x96a   :  { %v2584_v13 = vor.u32 %v2583_v7, %v2582_v6  ;;  %v2587_v18 = vshll.u32 %v2586_v9, 23  ;;  %v2620_v6 = vld [vmem:[%s5421_s1 + $0xb0] sm:$0xff]  ;;  %v2830_v7 = vld [vmem:[#allocation2 + $0x140] sm:$0xff]  ;;  %v2831_v9 = vld [vmem:[#allocation2 + $0x148] sm:$0xff] }
 0x96c   :  { %v2588_v25 = vor.u32 4788187, %v2587_v18  ;;  %v2591_v29 = vcvt.s32.f32 %v2584_v13  ;;  %v4384_v13 = vpack.c.bf16 %v2831_v9, %v2830_v7  ;;  %v2832_v18 = vld [vmem:[#allocation2 + $0x150] sm:$0xff] }
 0x96e   :  { %v2589_v21 = vand.u32 2147483647, %v2588_v25  ;;  %v2833_v25 = vld [vmem:[#allocation2 + $0x158] sm:$0xff] }
 0x970   :  { %v2592_v31 = vmul.f32 %v2591_v29, %v2589_v21 }
 0x972   :  { %v2593_v39 = vxor.u32 2147483648, %v2592_v31 }
 0x974   :  { %v2594_v47 = vsel %vm2511_vm5, %v2593_v39, %v2592_v31  ;;  %v4387_v39 = vpack.c.bf16 %v2833_v25, %v2832_v18 }
 0x975   :  { %v2597_v48 = vsel %vm2510_vm6, %v5230_v16, %v2594_v47  ;;  %v2621_v16 = vld [vmem:[%s5421_s1 + $0xb8] sm:$0xff]  ;;  %v2834_v47 = vld [vmem:[#allocation2 + $0x160] sm:$0xff] }
 0x976   :  { %4558 = vcosq.f32 %v2597_v48 }
 0x977   :  { %4560 = vsinq.f32 %v2597_v48 }
 0x980   :  { %v4559_v58 = vpop.eup %4558 }
 0x981   :  { %v4561_v20 = vpop.eup %4560  ;;  %v2609_v11 = vxor.u32 2147483648, %v4559_v58 }
 0x982   :  { %v2606_v61 = vxor.u32 2147483648, %v4561_v20 }
 0x983   :  { %v2610_v62 = vsel %vm2608_vm7, %v2609_v11, %v4561_v20  ;;  %v2836_v20 = vld [vmem:[#allocation2 + $0x170] sm:$0xff]  ;;  %v2837_v11 = vld [vmem:[#allocation2 + $0x178] sm:$0xff] }
 0x984   :  { %v2607_v34 = vsel %vm2605_vm8, %v4559_v58, %v2606_v61  ;;  %v4390_v58 = vpack.c.bf16 %v2835_v32, %v2834_v47 }
 0x985   :  { %v2611_v5 = vsel %vm2604_vm9, %v2607_v34, %v2610_v62  ;;  %v4393_v34 = vpack.c.bf16 %v2837_v11, %v2836_v20 }
 0x986   :  { %v2612_v3 = vsel %vm2601_vm10, nan, %v2611_v5 }
 0x987   :  { %v2613_v46 = vmul.f32 %v2612_v3, %v2612_v3 }
 0x989   :  { %v2614_v12 = vmul.f32 %v2613_v46, %v2507_v8 }
 0x98b   :  { %v2615_v10 = vadd.f32 %v2614_v12, %v5227_v19  ;;  %v3068_v12 = vld [vmem:[#allocation2 + $0x438] sm:$0xff] }
 0x98d   :  { %4058 = vmatpush3.msra.mxu0 %v2615_v10  ;;  %4444 = vmatpush3.msra.mxu1 %v2615_v10  ;;  %v3145_v10 = vld [vmem:[#allocation2 + $0x448] sm:$0xff] }
 0x98e   :  { %4060 = vmatmul.mubr.msk.f32.vlgmr.msra.gmra.mrb[8].mxu0 %vm789_vm11, %v2616_v17  ;;  %4075 = vmatmul.mubr.msk.f32.vlgmr.msra.gmra.mrb[32].mxu1 %vm789_vm11, %v2621_v16  ;;  %v4432_v17 = vpack.c.bf16 %v3145_v10, %v3144_v15  ;;  %v3146_v16 = vld [vmem:[#allocation2 + $0x450] sm:$0xff] }
 0x98f   :  { %4062 = vmatprep.mubr.msk.f32.mxu0 %vm4600_vm12, %v4601_v2  ;;  %4077 = vmatprep.mubr.msk.f32.mxu1 %vm4600_vm12, %v4601_v2 }
 0x990   :  { %4371 = vmatprep.subr.bf16.mxu0 %v4593_v0  ;;  %4194 = vmatprep.subr.mxu1 %v4601_v2 }
 0x991   :  { %4373 = vmatpush3.bf16.msra.mxu0 %v4372_v23  ;;  %v3147_v23 = vld [vmem:[#allocation2 + $0x458] sm:$0xff] }
 0x992   :  { %4063 = vmatmul.mubr.msk.f32.gmra.mrb[10].mxu0 %vm789_vm11, %v2617_v27  ;;  %4078 = vmatmul.mubr.msk.f32.gmra.mrb[34].mxu1 %vm789_vm11, %v2622_v30  ;;  %v4435_v24 = vpack.c.bf16 %v3147_v23, %v3146_v16  ;;  %v3149_v27 = vld [vmem:[#allocation2 + $0x468] sm:$0xff] }
 0x993   :  { %4065 = vmatprep.mubr.msk.f32.mxu0 %vm4600_vm12, %v4601_v2  ;;  %4374 = vmatprep.subr.bf16.mxu0 %v4593_v0  ;;  %v4438_v30 = vpack.c.bf16 %v3149_v27, %v3148_v26 }
 0x994   :  { %4196 = vmatprep.mubr.msk.f32.mxu1 %vm4600_vm12, %v4601_v2 }
 0x995   :  { %4376 = vmatpush3.bf16.msra.mxu0 %v4375_v50  ;;  %v3150_v50 = vld [vmem:[#allocation2 + $0x470] sm:$0xff] }
 0x996   :  { %4066 = vmatmul.mubr.msk.f32.gmra.mrb[12].mxu0 %vm789_vm11, %v2618_v41  ;;  %4377 = vmatprep.subr.bf16.mxu0 %v4593_v0  ;;  %v4441_v37 = vpack.c.bf16 %v3151_v35, %v3150_v50 }
 0x997   :  { %4068 = vmatprep.mubr.msk.f32.mxu0 %vm4600_vm12, %v4601_v2 }
 0x999   :  { %4379 = vmatpush3.bf16.msra.mxu0 %v4378_v51  ;;  %v3226_v51 = vld [vmem:[%s5422_s2 + $0xa0] sm:$0xff] }
 0x99a   :  { %4069 = vmatmul.mubr.msk.f32.gmra.mrb[14].mxu0 %vm789_vm11, %v2619_v45  ;;  %4380 = vmatprep.subr.bf16.mxu0 %v4593_v0 }
 0x99b   :  { %4071 = vmatprep.mubr.msk.f32.mxu0 %vm4600_vm12, %v4601_v2 }
 0x99d   :  { %4382 = vmatpush3.bf16.msra.mxu0 %v4381_v57 }
 0x99e   :  { %4072 = vmatmul.mubr.msk.f32.gmra.mrb[16].mxu0 %vm789_vm11, %v2620_v6  ;;  %4383 = vmatprep.subr.bf16.mxu0 %v4593_v0 }
 0x99f   :  { %4096 = vmatprep.mubr.msk.f32.mxu0 %vm4600_vm12, %v4601_v2 }
 0xa61   :  { %v2710_v21 = vpop.f32.mrb[8].mxu0  ;;  %v5314_v29 = vpop.f32.mrb[32].mxu1 }
 0xa62   :  { %v4061_v31 = vpop.f32.mrb[9].mxu0  ;;  %4097 = vmatmul.mubr.msk.f32.vlgmr.msra.gmra.mrb[14].mxu0 %vm922_vm13, %v2710_v21  ;;  %v4076_v22 = vpop.f32.mrb[33].mxu1 }
 0xa63   :  { %4385 = vmatpush3.bf16.msra.mxu0 %v4384_v13  ;;  %4115 = vmatprep.mubr.msk.f32.mxu0 %vm4600_vm12, %v4601_v2 }
 0xa64   :  { %4386 = vmatprep.subr.bf16.mxu0 %v4593_v0 }
 0xa65   :  { %v2715_v48 = vpop.f32.mrb[10].mxu0  ;;  %v5320_v1 = vpop.f32.mrb[34].mxu1 }
 0xa66   :  { %v4064_v55 = vpop.f32.mrb[11].mxu0  ;;  %v4079_v53 = vpop.f32.mrb[35].mxu1 }
 0xa67   :  { %4388 = vmatpush3.bf16.msra.mxu0 %v4387_v39 }
 0xa68   :  { %4389 = vmatprep.subr.bf16.mxu0 %v4593_v0 }
 0xa69   :  { %v2720_v61 = vpop.f32.mrb[12].mxu0 }
 0xa6a   :  { %v4067_v62 = vpop.f32.mrb[13].mxu0 }
 0xa6b   :  { %4391 = vmatpush3.bf16.msra.mxu0 %v4390_v58 }
 0xa6c   :  { %4392 = vmatprep.subr.bf16.mxu0 %v4593_v0 }
 0xa6f   :  { %4394 = vmatpush3.bf16.msra.mxu0 %v4393_v34 }
 0xa70   :  { %4395 = vmatprep.subr.bf16.mxu0 %v4593_v0 }
 0xa71   :  { %v2730_v5 = vpop.f32.mrb[16].mxu0 }
 0xa72   :  { %4116 = vmatmul.mubr.msk.f32.vlgmr.msra.gmra.mrb[14].mxu0 %vm922_vm13, %v2715_v48  ;;  %v4073_v8 = vpop.f32.mrb[17].mxu0 }
 0xa73   :  { %4397 = vmatpush3.bf16.msra.mxu0 %v5054_v54  ;;  %4134 = vmatprep.mubr.msk.f32.mxu0 %vm4600_vm12, %v4601_v2  ;;  %v3061_v54 = vld [vmem:[#allocation2 + $0x400] sm:$0xff] }
 0xa74   :  { %4398 = vmatprep.subr.bf16.mxu0 %v4593_v0 }
 0xa77   :  { %4400 = vmatpush3.bf16.msra.mxu0 %v5064_v28  ;;  %v3062_v28 = vld [vmem:[#allocation2 + $0x408] sm:$0xff] }
 0xa78   :  { %4401 = vmatprep.subr.bf16.mxu0 %v4593_v0 }
 0xa7b   :  { %4403 = vmatpush3.bf16.msra.mxu0 %v5074_v60  ;;  %v4420_v60 = vpack.c.bf16 %v3062_v28, %v3061_v54 }
 0xa7c   :  { %4404 = vmatprep.subr.bf16.mxu0 %v4593_v0 }
 0xa7f   :  { %4406 = vmatpush3.bf16.msra.mxu0 %v5084_v4  ;;  %v3063_v4 = vld [vmem:[#allocation2 + $0x410] sm:$0xff] }
 0xa80   :  { %4407 = vmatprep.subr.bf16.mxu0 %v4593_v0 }
 0xa82   :  { %4135 = vmatmul.mubr.msk.f32.vlgmr.msra.gmra.mrb[14].mxu0 %vm922_vm13, %v2720_v61 }
 0xa83   :  { %4409 = vmatpush3.bf16.msra.mxu0 %v5145_v49  ;;  %4153 = vmatprep.mubr.msk.f32.mxu0 %vm4600_vm12, %v4601_v2  ;;  %v3064_v49 = vld [vmem:[#allocation2 + $0x418] sm:$0xff] }
 0xa84   :  { %4410 = vmatprep.subr.bf16.mxu0 %v4593_v0  ;;  %v4423_v3 = vpack.c.bf16 %v3064_v49, %v3063_v4 }
 0xa87   :  { %4412 = vmatpush3.bf16.msra.mxu0 %v5150_v56  ;;  %v3065_v56 = vld [vmem:[#allocation2 + $0x420] sm:$0xff] }
 0xa88   :  { %4413 = vmatprep.subr.bf16.mxu0 %v4593_v0 }
 0xa8b   :  { %4415 = vmatpush3.bf16.msra.mxu0 %v5156_v59  ;;  %v3066_v59 = vld [vmem:[#allocation2 + $0x428] sm:$0xff] }
 0xa8c   :  { %4416 = vmatprep.subr.bf16.mxu0 %v4593_v0  ;;  %v4426_v46 = vpack.c.bf16 %v3066_v59, %v3065_v56 }
 0xa8f   :  { %4418 = vmatpush3.bf16.msra.mxu0 %v5160_v63  ;;  %v3067_v63 = vld [vmem:[#allocation2 + $0x430] sm:$0xff] }
 0xa90   :  { %4419 = vmatprep.subr.bf16.mxu0 %v4593_v0  ;;  %v4429_v14 = vpack.c.bf16 %v3068_v12, %v3067_v63 }
 0xa92   :  { %4154 = vmatmul.mubr.msk.f32.vlgmr.msra.gmra.mrb[14].mxu0 %vm922_vm13, %v2730_v5 }
 0xa93   :  { %4421 = vmatpush3.bf16.msra.mxu0 %v4420_v60  ;;  %4172 = vmatprep.mubr.msk.f32.mxu0 %vm4600_vm12, %v4601_v2 }
 0xa94   :  { %4422 = vmatprep.subr.bf16.mxu0 %v4593_v0 }
 0xa97   :  { %4424 = vmatpush3.bf16.msra.mxu0 %v4423_v3 }
 0xa98   :  { %4425 = vmatprep.subr.bf16.mxu0 %v4593_v0 }
 0xa9b   :  { %4427 = vmatpush3.bf16.msra.mxu0 %v4426_v46 }
 0xa9c   :  { %4428 = vmatprep.subr.bf16.mxu0 %v4593_v0 }
 0xa9f   :  { %4430 = vmatpush3.bf16.msra.mxu0 %v4429_v14 }
 0xaa0   :  { %4431 = vmatprep.subr.bf16.mxu0 %v4593_v0 }
 0xaa2   :  { %4173 = vmatmul.mubr.msk.f32.vlgmr.msra.gmra.mrb[14].mxu0 %vm922_vm13, %v5314_v29 }
 0xaa3   :  { %4433 = vmatpush3.bf16.msra.mxu0 %v4432_v17  ;;  %4191 = vmatprep.mubr.msk.f32.mxu0 %vm4600_vm12, %v4601_v2  ;;  %v2744_v2 = vld [vmem:[%s5422_s2 + $0x98] sm:$0xff] }
 0xaa4   :  { %4434 = vmatprep.subr.bf16.mxu0 %v4593_v0 }
 0xaa7   :  { %4436 = vmatpush3.bf16.msra.mxu0 %v4435_v24 }
 0xaa8   :  { %4437 = vmatprep.subr.bf16.mxu0 %v4593_v0 }
 0xaab   :  { %4439 = vmatpush3.bf16.msra.mxu0 %v4438_v30 }
 0xaac   :  { %4440 = vmatprep.subr.bf16.mxu0 %v4593_v0 }
 0xaaf   :  { %4442 = vmatpush3.bf16.msra.mxu0 %v4441_v37 }
 0xab2   :  { %4192 = vmatmul.mubr.msk.f32.vlgmr.msra.gmra.mrb[14].mxu0 %vm922_vm13, %v5320_v1 }
 0xb85   :  { %v3221_v41 = vpop.f32.mrb[14].mxu0 }
 0xb86   :  { %v5369_v43 = vadd.f32 %v3221_v41, %v2744_v2  ;;  %v4193_v33 = vpop.f32.mrb[15].mxu0 }
 0xb88   :  { %v5372_v45 = vmul.f32 %v5369_v43, %v3226_v51 }
 0xb8a   :  { %v3232_v0 = vand.u32 2139095040, %v5372_v45  ;;  %v3229_v9 = vand.u32 2147483647, %v5372_v45  ;;  %vm3231_vm4 = vcmp.lt.s32.totalorder %v5372_v45, 0  ;;  %vm3321_vm9 = vweird.f32 %v5372_v45 }
 0xb8c   :  { %v3233_v57 = vshrl.u32 %v3232_v0, 23  ;;  %v3236_v25 = vand.u32 8388607, %v3229_v9  ;;  %vm3230_vm5 = vcmp.le.f32.partialorder %v3229_v9, 0.7853982 }
 0xb8e   :  { %v3496_v6 = vadd.s32 4294967169, %v3233_v57  ;;  %v3237_v20 = vor.u32 8388608, %v3236_v25 }
 0xb90   :  { %v3239_v7 = vadd.s32 1, %v3496_v6 }
 0xb92   :  { %vm3240_vm12 = vcmp.gt.s32.totalorder %v3239_v7, 0 }
 0xb93   :  { %v3241_v13 = vsel %vm3240_vm12, %v3239_v7, 0 }
 0xb94   :  { %v3243_v18 = vand.u32 31, %v3241_v13  ;;  %v3242_v29 = vshrl.u32 %v3241_v13, 5 }
 0xb96   :  { %v3244_v21 = vsub.s32 32, %v3243_v18  ;;  %v3246_v31 = vshll.u32 %v4594_v36, %v3243_v18  ;;  %v3249_v22 = vshll.u32 %v4595_v38, %v3243_v18  ;;  %v3252_v32 = vshll.u32 %v4596_v40, %v3243_v18 }
 0xb97   :  { %v3255_v1 = vshll.u32 %v4597_v42, %v3243_v18  ;;  %v3258_v53 = vshll.u32 %v4598_v44, %v3243_v18  ;;  %vm3261_vm0 = vcmp.lt.s32.totalorder %v3242_v29, 1  ;;  %vm3264_vm14 = vcmp.lt.s32.totalorder %v3242_v29, 4 }
 0xb98   :  { %v3247_v39 = vshrl.u32 %v4595_v38, %v3244_v21  ;;  %v3250_v47 = vshrl.u32 %v4596_v40, %v3244_v21  ;;  %v3253_v48 = vshrl.u32 %v4597_v42, %v3244_v21  ;;  %v3256_v55 = vshrl.u32 %v4598_v44, %v3244_v21 }
 0xb99   :  { %v3259_v58 = vshrl.u32 %v4599_v52, %v3244_v21  ;;  %v3245_v54 = vshrl.u32 %v4594_v36, %v3244_v21  ;;  %vm3263_vm15 = vcmp.lt.s32.totalorder %v3242_v29, 3  ;;  %vm3262_vm1 = vcmp.lt.s32.totalorder %v3242_v29, 2 }
 0xb9a   :  { %v3248_v11 = vor.u32 %v3247_v39, %v3246_v31  ;;  %v3251_v61 = vor.u32 %v3250_v47, %v3249_v22  ;;  %v3254_v62 = vor.u32 %v3253_v48, %v3252_v32  ;;  %v3257_v34 = vor.u32 %v3256_v55, %v3255_v1 }
 0xb9b   :  { %v3260_v38 = vor.u32 %v3259_v58, %v3258_v53  ;;  %v3277_v52 = vshll.u32 %v3237_v20, 8 }
 0xb9c   :  { %v3266_v5 = vsel %vm3264_vm14, %v3254_v62, 2102212464  ;;  %v3269_v40 = vsel %vm3261_vm0, %v3248_v11, %v3251_v61  ;;  %v3273_v8 = vsel %vm3261_vm0, %v3251_v61, %v3254_v62  ;;  %v3270_v42 = vsel %vm3264_vm14, %v3257_v34, 920167782 }
 0xb9d   :  { %v3274_v28 = vsel %vm3264_vm14, %v3260_v38, 1326507024  ;;  %v3271_v44 = vsel %vm3263_vm15, %v3254_v62, %v3270_v42  ;;  %v3265_v4 = vsel %vm3261_vm0, %v3245_v54, %v3248_v11  ;;  %v3267_v49 = vsel %vm3263_vm15, %v3251_v61, %v3266_v5  ;;  %v3227_v62 = vld [vmem:[%s5422_s2 + $0xa8] sm:$0xff] }
 0xb9e   :  { %v3275_v60 = vsel %vm3263_vm15, %v3257_v34, %v3274_v28  ;;  %v3272_v3 = vsel %vm3262_vm1, %v3269_v40, %v3271_v44  ;;  %v3268_v14 = vsel %vm3262_vm1, %v3265_v4, %v3267_v49 }
 0xb9f   :  { %v3276_v56 = vsel %vm3262_vm1, %v3273_v8, %v3275_v60  ;;  %v5392_v63 = vmul.u32.u64.low %v3277_v52, %v3272_v3  ;;  %v5393_v12 = vmul.u32.u64.high %v3277_v52, %v3272_v3, %v5392_v63  ;;  %v3284_v15 = vmul.u32 %v3277_v52, %v3268_v14  ;;  %v3336_v8 = vld [vmem:[%s5421_s1 + $0xd8] sm:$0xff] }
 0xba0   :  { %v5389_v59 = vmul.u32.u64.low %v3277_v52, %v3276_v56  ;;  %v5390_v46 = vmul.u32.u64.high %v3277_v52, %v3276_v56, %v5389_v59 }
 0xba1   :  { %v3287_v36 = vadd.s32 1, %v5393_v12 }
 0xba2   :  { %vm3286_vm2 = vc.u32 %v5390_v46, %v5392_v63  ;;  %v3285_v2 = vadd.s32 %v5392_v63, %v5390_v46 }
 0xba3   :  { %v3288_v10 = vsel %vm3286_vm2, %v3287_v36, %v5393_v12 }
 0xba4   :  { %v3289_v17 = vadd.s32 %v3288_v10, %v3284_v15 }
 0xba6   :  { %v3290_v16 = vadd.s32 536870912, %v3289_v17 }
 0xba8   :  { %v3291_v23 = vshrl.u32 %v3290_v16, 30 }
 0xbaa   :  { %v3292_v24 = vshll.u32 %v3291_v23, 30  ;;  %v3315_v29 = vsub.s32 4, %v3291_v23 }
 0xbac   :  { %v3293_v26 = vsub.s32 %v3289_v17, %v3292_v24  ;;  %v3316_v39 = vsel %vm3231_vm4, %v3315_v29, %v3291_v23 }
 0xbad   :  { %v3318_v32 = vsel %vm3230_vm5, 0, %v3316_v39 }
 0xbae   :  { %v3295_v27 = vsub.s32 0, %v3293_v26  ;;  %v3322_v48 = vadd.s32 3, %v3318_v32 }
 0xbb0   :  { %v3497_v30 = vmin.u32 %v3295_v27, %v3293_v26  ;;  %v3323_v1 = vand.u32 3, %v3322_v48 }
 0xbb2   :  { %v3297_v50 = vclz %v3497_v30  ;;  %vm3328_vm6 = vcmp.eq.s32.totalorder %v3323_v1, 2  ;;  %vm3325_vm7 = vcmp.eq.s32.totalorder %v3323_v1, 0  ;;  %vm3324_vm8 = vcmp.lt.s32.totalorder %v3323_v1, 2 }
 0xbb4   :  { %v3498_v35 = vadd.s32 4294967294, %v3297_v50 }
 0xbb6   :  { %vm3499_vm3 = vcmp.lt.s32.totalorder %v3498_v35, 0 }
 0xbb7   :  { %v3300_v37 = vsel %vm3499_vm3, 0, %v3498_v35 }
 0xbb8   :  { %v3301_v41 = vsub.s32 32, %v3300_v37  ;;  %v3305_v51 = vsub.s32 4294967266, %v3300_v37  ;;  %v3302_v33 = vshll.u32 %v3293_v26, %v3300_v37 }
 0xbba   :  { %v3303_v0 = vshrl.u32 %v3285_v2, %v3301_v41  ;;  %v3306_v57 = vadd.s32 127, %v3305_v51 }
 0xbbc   :  { %v3304_v6 = vor.u32 %v3303_v0, %v3302_v33  ;;  %v3307_v7 = vshll.u32 %v3306_v57, 23 }
 0xbbe   :  { %v3308_v13 = vor.u32 4788187, %v3307_v7  ;;  %v3311_v25 = vcvt.s32.f32 %v3304_v6 }
 0xbc0   :  { %v3309_v18 = vand.u32 2147483647, %v3308_v13 }
 0xbc2   :  { %v3312_v21 = vmul.f32 %v3311_v25, %v3309_v18 }
 0xbc4   :  { %v3313_v31 = vxor.u32 2147483648, %v3312_v21 }
 0xbc6   :  { %v3314_v22 = vsel %vm3231_vm4, %v3313_v31, %v3312_v21 }
 0xbc7   :  { %v3317_v47 = vsel %vm3230_vm5, %v5372_v45, %v3314_v22  ;;  %v3411_v45 = vld [vmem:[%s5422_s2 + $0xb0] sm:$0xff] }
 0xbc8   :  { %4562 = vcosq.f32 %v3317_v47 }
 0xbc9   :  { %4564 = vsinq.f32 %v3317_v47 }
 0xbd2   :  { %v4563_v55 = vpop.eup %4562 }
 0xbd3   :  { %v4565_v53 = vpop.eup %4564  ;;  %v3329_v58 = vxor.u32 2147483648, %v4563_v55 }
 0xbd4   :  { %v3326_v20 = vxor.u32 2147483648, %v4565_v53 }
 0xbd5   :  { %v3330_v11 = vsel %vm3328_vm6, %v3329_v58, %v4565_v53 }
 0xbd6   :  { %v3327_v61 = vsel %vm3325_vm7, %v4563_v55, %v3326_v20 }
 0xbd7   :  { %v3331_v9 = vsel %vm3324_vm8, %v3327_v61, %v3330_v11 }
 0xbd8   :  { %v3332_v34 = vsel %vm3321_vm9, nan, %v3331_v9 }
 0xbd9   :  { %v3333_v38 = vmul.f32 %v3332_v34, %v3332_v34 }
 0xbdb   :  { %v3334_v5 = vmul.f32 %v3333_v38, %v3227_v62 }
 0xbdd   :  { %v3335_v40 = vadd.f32 %v5369_v43, %v3334_v5 }
 0xbdf   :  { %4195 = vmatpush3.msra.mxu1 %v3335_v40 }
 0xbe0   :  { %4197 = vmatmul.mubr.msk.f32.vlgmr.msra.gmra.mrb[36].mxu1 %vm789_vm11, %v3336_v8 }
 0xcb3   :  { %v3406_v54 = vpop.f32.mrb[36].mxu1 }
 0xcb4   :  { %v3410_v42 = vadd.f32 %v3406_v54, %v5227_v19  ;;  %v4198_v28 = vpop.f32.mrb[37].mxu1 }
 0xcb6   :  { %v3412_v44 = vadd.f32 %v3411_v45, %v3410_v42 }
 0xcb8   :  { %3413 = vst.msk [vmem:[%s5424_s4] sm:$0xff] %vm922_vm13, %v3412_v44 }
 0xcb9   :  { %3418 = vsyncpa [#allocation3], 1 }

</bundles_post_ra>
